<compile_context>
chip_gen: v7x
topology: tpu7x:2x2x1
jax: 0.10.0
libtpu: 0.0.40
codegen_flags: <defaults>
</compile_context>

<pallas_src>
import jax
import jax.numpy as jnp
from jax.experimental import pallas as pl
from jax.experimental.pallas import tpu as pltpu


def _ru8(n):
    return (n + 7) // 8 * 8


# ----------------------------------------------------------------------------
# Fused kernel: GCN stack + readout + decomposed fc1/fc2 + relevance MLP + blend
# ----------------------------------------------------------------------------
def fused_kernel(*refs):
    num_layers = len(refs) - 6
    a_ref, x_ref, relm_ref = refs[0], refs[1], refs[2]
    gcn_refs = refs[3:3 + num_layers]
    fc1_ref = refs[3 + num_layers]
    mlp_ref = refs[4 + num_layers]
    out_ref = refs[5 + num_layers]

    Bt, Nn, _ = a_ref.shape
    Nnode = Nn - 1

    A = a_ref[...].astype(jnp.float32)           # (Bt, Nn, Nn); bf16 in HBM
    xv = x_ref[...]                               # (Bt, Nn, F0) f32

    # ---- GCN stack (statically unrolled; activations stay in vregs/VMEM) ----
    # A @ X is accumulated on the VPU (Nn is tiny, a batched-MXU einsum would
    # run Bt independent <4%-utilization matmuls); the flattened X @ W runs as
    # one large MXU matmul with bf16 inputs / f32 accumulation.
    for gref in gcn_refs:
        wp = gref[...]                            # (_ru8(Fin)+8, Fout)
        fin = xv.shape[-1]
        fout = wp.shape[1]
        W = wp[:fin, :]
        b = wp[_ru8(fin):_ru8(fin) + 1, :]        # (1, Fout), 8-row-aligned

        ax = A[:, :, 0:1] * xv[:, 0:1, :]
        for j in range(1, Nn):
            ax = ax + A[:, :, j:j + 1] * xv[:, j:j + 1, :]   # (Bt, Nn, Fin)

        y = jnp.dot(ax.reshape(Bt * Nn, fin).astype(jnp.bfloat16),
                    W.astype(jnp.bfloat16),
                    preferred_element_type=jnp.float32)       # (Bt*Nn, Fout)
        xv = jnp.maximum(y.reshape(Bt, Nn, fout) + b[None, :, :], 0.0)

    D = xv.shape[-1]                              # output_dim
    rD = _ru8(D)

    # ---- head: decomposed fc1 (no concat); all pack slices 8-row-aligned ----
    fc1p = fc1_ref[...]                           # (3*rD + 16, 50)
    W_nodes = fc1p[0:D, :]                        # per-node embedding rows
    W_h = fc1p[rD:rD + D, :]                      # graph readout rows
    W_ctx = fc1p[2 * rD:2 * rD + D, :]            # context node rows
    w_deg = fc1p[3 * rD:3 * rD + 1, :]            # (1, 50) degree column of fc1
    fc1b = fc1p[3 * rD + 8:3 * rD + 9, :]         # (1, 50)

    # graph readout h (mean over all Nn nodes) and context node (LAST row after
    # the wrapper's permutation).   TODO(synk): readout choice inferred.
    h = jnp.sum(xv, axis=1) * (1.0 / Nn)          # (Bt, D)
    ctx = xv[:, Nnode, :]                         # (Bt, D)

    # per-batch-element contribution, computed once and broadcast over nodes
    hc = (jnp.dot(h, W_h, preferred_element_type=jnp.float32)
          + jnp.dot(ctx, W_ctx, preferred_element_type=jnp.float32)
          + fc1b)                                 # (Bt, 50)

    # node contribution: one MXU matmul over all Nn rows (context row dropped
    # after; it is the LAST row so the kept slice starts at row 0 = no-op view)
    zn_all = jnp.dot(xv.reshape(Bt * Nn, D).astype(jnp.bfloat16),
                     W_nodes.astype(jnp.bfloat16),
                     preferred_element_type=jnp.float32).reshape(Bt, Nn, 50)

    relm = relm_ref[...]                          # (Bt, Nnode, 24) f32
    deg = relm[:, :, 18:19]                       # (Bt, Nnode, 1) degree feature
    z = zn_all[:, :Nnode, :] + hc[:, None, :] + deg * w_deg[None, :, :]
    z = jnp.maximum(z, 0.0)                       # (Bt, Nnode, 50), dropout = identity

    # ---- relevance MLP (packed, zero-padded, 8-row-aligned buffer) ----
    mlp = mlp_ref[...]                            # (120, 50)
    n1w = mlp[0:24, :]                            # rows 18:24 zero (deg/pad lanes)
    n2w = mlp[24:74, :]                           # only [0:18, 0:8] nonzero
    n1b = mlp[80:81, :]
    n2b = mlp[88:89, :]
    n3w_h = mlp[96:97, :]                         # 0.5 * nfc3.w  (blend folded)
    fc2w_h = mlp[104:105, :]                      # 0.5 * fc2.w   (blend folded)
    bias_c = mlp[112:113, 0:1]                    # 0.5 * (nfc3.b + fc2.b)

    rel2 = relm.reshape(Bt * Nnode, 24)           # degree/pad lanes hit zero rows of n1w
    s1 = jnp.maximum(jnp.dot(rel2, n1w, preferred_element_type=jnp.float32) + n1b, 0.0)
    s2 = jnp.maximum(jnp.dot(s1, n2w, preferred_element_type=jnp.float32) + n2b, 0.0)
    s2 = s2.reshape(Bt, Nnode, 50)

    # single fused cross-lane reduction for both score branches
    blend = jnp.sum(z * fc2w_h[None, :, :] + s2 * n3w_h[None, :, :], axis=-1) + bias_c
    out_ref[...] = blend.reshape(1, 1, Bt * Nnode)   # lane-dense store


# ----------------------------------------------------------------------------
# Wrapper
# ----------------------------------------------------------------------------
def _tpu_vmem_bytes():
    try:
        return int(pltpu.get_tpu_info().vmem_capacity_bytes)
    except Exception:
        return 64 << 20          # conservative default (v7x per-TensorCore VMEM)


def _pick_block_b(B, *, max_bt=256):
    # ~160 KiB VMEM per batch element at these shapes ((8,128)-padded blocks,
    # x2 double-buffering, f32 in-kernel intermediates); keep 2/3 headroom.
    per_elem_bytes = 160 << 10
    budget = _tpu_vmem_bytes() // 3
    cap = max(1, min(max_bt, budget // per_elem_bytes))
    if B <= cap:
        return B                 # single grid step: per-step overhead dominates at small B
    best = 1
    for bt in range(1, cap + 1): # largest divisor of B not exceeding the VMEM cap
        if B % bt == 0:
            best = bt
    return best


def graph4div_forward(A, x, rel_feat, degree_feat, gcn_packs, fc1_pack, mlp_pack,
                      *, block_b=None):
    B, Nn, F0 = x.shape
    Nnode = Nn - 1

    # Move the context node (index 0) to the LAST index so the head's
    # document-node slice starts at row 0 (no sublane-shift relayout in-kernel).
    A_p = jnp.roll(jnp.roll(A, -1, axis=1), -1, axis=2).astype(jnp.bfloat16)
    x_p = jnp.roll(x, -1, axis=1)

    # Merge degree into rel_feat: cols 0:18 = rel, col 18 = degree, 19:24 = 0.
    relm = jnp.concatenate(
        [rel_feat, degree_feat.astype(rel_feat.dtype),
         jnp.zeros((B, Nnode, 5), rel_feat.dtype)], axis=2)

    Bt = block_b or _pick_block_b(B)
    assert B % Bt == 0
    G = B // Bt

    def bmap(i):
        return (i, 0, 0)

    def wmap(i):
        return (0, 0)

    in_specs = [
        pl.BlockSpec((Bt, Nn, Nn), bmap),
        pl.BlockSpec((Bt, Nn, F0), bmap),
        pl.BlockSpec((Bt, Nnode, 24), bmap),
    ]
    for wp in gcn_packs:
        in_specs.append(pl.BlockSpec(wp.shape, wmap))
    in_specs.append(pl.BlockSpec(fc1_pack.shape, wmap))
    in_specs.append(pl.BlockSpec(mlp_pack.shape, wmap))

    vmem_limit = min(max(32 << 20, (_tpu_vmem_bytes() * 3) // 4), 96 << 20)

    out = pl.pallas_call(
        fused_kernel,
        out_shape=jax.ShapeDtypeStruct((G, 1, Bt * Nnode), jnp.float32),
        grid_spec=pltpu.PrefetchScalarGridSpec(
            num_scalar_prefetch=0,
            grid=(G,),
            in_specs=in_specs,
            out_specs=pl.BlockSpec((1, 1, Bt * Nnode), lambda i: (i, 0, 0)),
        ),
        compiler_params=pltpu.CompilerParams(
            dimension_semantics=("parallel",),
            vmem_limit_bytes=int(vmem_limit)),
    )(A_p, x_p, relm, *gcn_packs, fc1_pack, mlp_pack)
    return out.reshape(-1)                        # (B * node_num,)


# ----------------------------------------------------------------------------
# Parameter construction (deterministic, xavier-normal style) + packing
# ----------------------------------------------------------------------------
def xavier_normal(key, fan_in, fan_out):
    std = (2.0 / (fan_in + fan_out)) ** 0.5
    return std * jax.random.normal(key, (fan_in, fan_out), dtype=jnp.float32)


def make_params(key, node_feature_dim, hidden_dim, output_dim):
    dims = [node_feature_dim] + list(hidden_dim) + [output_dim]
    nl = len(dims) - 1
    keys = jax.random.split(key, 2 * nl + 12)
    ki = iter(range(len(keys)))

    # Per-layer pack: rows 0:Fin = W, row _ru8(Fin) = b (8-row-aligned bias).
    gcn_packs = []
    for li in range(nl):
        fin, fout = dims[li], dims[li + 1]
        W = xavier_normal(keys[next(ki)], fin, fout)
        b = 0.1 * jax.random.normal(keys[next(ki)], (fout,), dtype=jnp.float32)
        pack = jnp.zeros((_ru8(fin) + 8, fout), jnp.float32)
        pack = pack.at[:fin, :].set(W)
        pack = pack.at[_ru8(fin), :].set(b)
        gcn_packs.append(pack)

    D = output_dim
    rD = _ru8(D)
    # fc1 weight rows: [nodes(D), h(D), ctx(D), deg(1)] -> packed at 8-aligned offsets.
    fc1w = xavier_normal(keys[next(ki)], 3 * D + 1, 50)
    fc1b = 0.1 * jax.random.normal(keys[next(ki)], (50,), dtype=jnp.float32)
    fc1_pack = jnp.zeros((3 * rD + 16, 50), jnp.float32)
    fc1_pack = fc1_pack.at[0:D, :].set(fc1w[0:D])
    fc1_pack = fc1_pack.at[rD:rD + D, :].set(fc1w[D:2 * D])
    fc1_pack = fc1_pack.at[2 * rD:2 * rD + D, :].set(fc1w[2 * D:3 * D])
    fc1_pack = fc1_pack.at[3 * rD, :].set(fc1w[3 * D])
    fc1_pack = fc1_pack.at[3 * rD + 8, :].set(fc1b)

    n1w = xavier_normal(keys[next(ki)], 18, 18)
    n1b = 0.1 * jax.random.normal(keys[next(ki)], (18,), dtype=jnp.float32)
    n2w = xavier_normal(keys[next(ki)], 18, 8)
    n2b = 0.1 * jax.random.normal(keys[next(ki)], (8,), dtype=jnp.float32)
    n3w = xavier_normal(keys[next(ki)], 8, 1)
    n3b = 0.1 * jax.random.normal(keys[next(ki)], (1,), dtype=jnp.float32)
    fc2w = xavier_normal(keys[next(ki)], 50, 1)
    fc2b = 0.1 * jax.random.normal(keys[next(ki)], (1,), dtype=jnp.float32)

    # 8-row-aligned packed small-MLP buffer (biases non-zero; blend 0.5 folded):
    #   rows   0:24  -> nfc1.W padded to (24, 50)      (rows/cols beyond 18 zero)
    #   rows  24:74  -> nfc2.W embedded in (50, 50)    ([0:18, 0:8] nonzero)
    #   row   80     -> nfc1.b   row 88 -> nfc2.b
    #   row   96     -> 0.5*nfc3.w   row 104 -> 0.5*fc2.w
    #   row  112,col0-> 0.5*(nfc3.b + fc2.b)
    mlp_pack = jnp.zeros((120, 50), jnp.float32)
    mlp_pack = mlp_pack.at[0:18, 0:18].set(n1w)
    mlp_pack = mlp_pack.at[24:42, 0:8].set(n2w)
    mlp_pack = mlp_pack.at[80, 0:18].set(n1b)
    mlp_pack = mlp_pack.at[88, 0:8].set(n2b)
    mlp_pack = mlp_pack.at[96, 0:8].set(0.5 * n3w[:, 0])
    mlp_pack = mlp_pack.at[104, 0:50].set(0.5 * fc2w[:, 0])
    mlp_pack = mlp_pack.at[112, 0].set(0.5 * (n3b[0] + fc2b[0]))
    return gcn_packs, fc1_pack, mlp_pack


# ----------------------------------------------------------------------------
# Pure-JAX reference (un-decomposed concat form, context node at index 0,
# f32 everywhere — like the PyTorch code)
# ----------------------------------------------------------------------------
def graph4div_reference(A, x, rel_feat, degree_feat, gcn_packs, fc1_pack, mlp_pack):
    for wp in gcn_packs:
        fin = x.shape[-1]
        W, b = wp[:fin], wp[_ru8(fin)]
        x = jax.nn.relu(jnp.einsum('bij,bjf->bif', A, x) @ W + b)
    B, Nn, D = x.shape
    rD = _ru8(D)
    Nnode = Nn - 1
    h = jnp.mean(x, axis=1, keepdims=True)
    ctx = x[:, 0:1, :]
    fc1w = jnp.concatenate([fc1_pack[0:D], fc1_pack[rD:rD + D],
                            fc1_pack[2 * rD:2 * rD + D],
                            fc1_pack[3 * rD:3 * rD + 1]], axis=0)
    fc1b = fc1_pack[3 * rD + 8]
    feat = jnp.concatenate(
        [x[:, 1:, :], jnp.broadcast_to(h, (B, Nnode, D)),
         jnp.broadcast_to(ctx, (B, Nnode, D)), degree_feat], axis=2)
    z = jax.nn.relu(feat @ fc1w + fc1b)
    n1w = mlp_pack[0:18, 0:18]; n1b = mlp_pack[80, 0:18]
    n2w = mlp_pack[24:42, 0:8]; n2b = mlp_pack[88, 0:8]
    n3w_h = mlp_pack[96, 0:8]
    fc2w_h = mlp_pack[104, 0:50]
    bias_c = mlp_pack[112, 0]
    sg = z @ fc2w_h                               # 0.5 already folded in
    s1 = jax.nn.relu(rel_feat @ n1w + n1b)
    s2 = jax.nn.relu(s1 @ n2w + n2b)
    sr = s2 @ n3w_h
    return (sr + sg + bias_c).reshape(-1)


if __name__ == "__main__":
    B = 2
    node_num = 8                 # ranked documents per query
    Nn = node_num + 1            # + context/query node
    node_feature_dim = 16
    hidden_dim = [32]
    output_dim = 16

    key = jax.random.PRNGKey(0)
    k_a, k_x, k_rel, k_deg, k_p = jax.random.split(key, 5)

    A_raw = jax.random.uniform(k_a, (B, Nn, Nn), dtype=jnp.float32)
    A = 0.5 * (A_raw + jnp.swapaxes(A_raw, 1, 2)) + jnp.eye(Nn, dtype=jnp.float32)[None]

    x = jax.random.normal(k_x, (B, Nn, node_feature_dim), dtype=jnp.float32)
    rel_feat = jax.random.normal(k_rel, (B, node_num, 18), dtype=jnp.float32)
    degree_feat = jax.random.normal(k_deg, (B, node_num, 1), dtype=jnp.float32)

    gcn_packs, fc1_pack, mlp_pack = make_params(
        k_p, node_feature_dim, hidden_dim, output_dim)

    out = graph4div_forward(A, x, rel_feat, degree_feat,
                            gcn_packs, fc1_pack, mlp_pack)
    out = jax.block_until_ready(out)
    assert out.shape == (B * node_num,)
    assert bool(jnp.all(jnp.isfinite(out)))

    # cross-check against the pure-JAX f32 reference (loose tol: bf16 MXU inputs)
    ref = graph4div_reference(A, x, rel_feat, degree_feat,
                              gcn_packs, fc1_pack, mlp_pack)
    err = float(jnp.max(jnp.abs(out - ref))) / (float(jnp.max(jnp.abs(ref))) + 1e-6)
    assert err < 5e-2, f"kernel/reference mismatch: {err}"

    print("KERNEL_OK")
</pallas_src>

<mosaic_0001>
module attributes {stable_mosaic.version = 11 : i64} {
  func.func @fused_kernel(%arg0: i32, %arg1: memref<2x9x9xbf16, #tpu.memory_space<vmem>>, %arg2: memref<2x9x16xf32, #tpu.memory_space<vmem>>, %arg3: memref<2x8x24xf32, #tpu.memory_space<vmem>>, %arg4: memref<24x32xf32, #tpu.memory_space<vmem>>, %arg5: memref<40x16xf32, #tpu.memory_space<vmem>>, %arg6: memref<64x50xf32, #tpu.memory_space<vmem>>, %arg7: memref<120x50xf32, #tpu.memory_space<vmem>>, %arg8: memref<1x1x16xf32, #tpu.memory_space<vmem>>) attributes {dimension_semantics = [#tpu.dimension_semantics<parallel>], iteration_bounds = array<i64: 1>, scalar_prefetch = 0 : i64, scratch_operands = 0 : i64, tpu.core_type = #tpu.core_type<tc>, window_params = [{transform_indices = @transform_0, window_bounds = array<i64: 2, 9, 9>}, {transform_indices = @transform_1, window_bounds = array<i64: 2, 9, 16>}, {transform_indices = @transform_2, window_bounds = array<i64: 2, 8, 24>}, {pipeline_mode = #tpu.pipeline_mode<synchronous>, transform_indices = @transform_3, window_bounds = array<i64: 24, 32>}, {pipeline_mode = #tpu.pipeline_mode<synchronous>, transform_indices = @transform_4, window_bounds = array<i64: 40, 16>}, {pipeline_mode = #tpu.pipeline_mode<synchronous>, transform_indices = @transform_5, window_bounds = array<i64: 64, 50>}, {pipeline_mode = #tpu.pipeline_mode<synchronous>, transform_indices = @transform_6, window_bounds = array<i64: 120, 50>}, {transform_indices = @transform_7, window_bounds = array<i64: 1, 1, 16>}]} {
    %c0 = arith.constant 0 : index
    %c0_0 = arith.constant 0 : index
    %c0_1 = arith.constant 0 : index
    %0 = vector.load %arg1[%c0, %c0_0, %c0_1] : memref<2x9x9xbf16, #tpu.memory_space<vmem>>, vector<2x9x9xbf16>
    %1 = arith.extf %0 : vector<2x9x9xbf16> to vector<2x9x9xf32>
    %c0_2 = arith.constant 0 : index
    %c0_3 = arith.constant 0 : index
    %c0_4 = arith.constant 0 : index
    %2 = vector.load %arg2[%c0_2, %c0_3, %c0_4] : memref<2x9x16xf32, #tpu.memory_space<vmem>>, vector<2x9x16xf32>
    %c0_5 = arith.constant 0 : index
    %c0_6 = arith.constant 0 : index
    %3 = vector.load %arg4[%c0_5, %c0_6] : memref<24x32xf32, #tpu.memory_space<vmem>>, vector<24x32xf32>
    %4 = vector.extract_strided_slice %3 {offsets = [0, 0], sizes = [16, 32], strides = [1, 1]} : vector<24x32xf32> to vector<16x32xf32>
    %5 = vector.extract_strided_slice %3 {offsets = [16, 0], sizes = [1, 32], strides = [1, 1]} : vector<24x32xf32> to vector<1x32xf32>
    %6 = vector.extract_strided_slice %1 {offsets = [0, 0, 0], sizes = [2, 9, 1], strides = [1, 1, 1]} : vector<2x9x9xf32> to vector<2x9x1xf32>
    %7 = vector.extract_strided_slice %2 {offsets = [0, 0, 0], sizes = [2, 1, 16], strides = [1, 1, 1]} : vector<2x9x16xf32> to vector<2x1x16xf32>
    %8 = vector.broadcast %6 : vector<2x9x1xf32> to vector<2x9x16xf32>
    %9 = vector.broadcast %7 : vector<2x1x16xf32> to vector<2x9x16xf32>
    %10 = arith.mulf %8, %9 : vector<2x9x16xf32>
    %11 = vector.extract_strided_slice %1 {offsets = [0, 0, 1], sizes = [2, 9, 1], strides = [1, 1, 1]} : vector<2x9x9xf32> to vector<2x9x1xf32>
    %12 = vector.extract_strided_slice %2 {offsets = [0, 1, 0], sizes = [2, 1, 16], strides = [1, 1, 1]} : vector<2x9x16xf32> to vector<2x1x16xf32>
    %13 = vector.broadcast %11 : vector<2x9x1xf32> to vector<2x9x16xf32>
    %14 = vector.broadcast %12 : vector<2x1x16xf32> to vector<2x9x16xf32>
    %15 = arith.mulf %13, %14 : vector<2x9x16xf32>
    %16 = arith.addf %10, %15 : vector<2x9x16xf32>
    %17 = vector.extract_strided_slice %1 {offsets = [0, 0, 2], sizes = [2, 9, 1], strides = [1, 1, 1]} : vector<2x9x9xf32> to vector<2x9x1xf32>
    %18 = vector.extract_strided_slice %2 {offsets = [0, 2, 0], sizes = [2, 1, 16], strides = [1, 1, 1]} : vector<2x9x16xf32> to vector<2x1x16xf32>
    %19 = vector.broadcast %17 : vector<2x9x1xf32> to vector<2x9x16xf32>
    %20 = vector.broadcast %18 : vector<2x1x16xf32> to vector<2x9x16xf32>
    %21 = arith.mulf %19, %20 : vector<2x9x16xf32>
    %22 = arith.addf %16, %21 : vector<2x9x16xf32>
    %23 = vector.extract_strided_slice %1 {offsets = [0, 0, 3], sizes = [2, 9, 1], strides = [1, 1, 1]} : vector<2x9x9xf32> to vector<2x9x1xf32>
    %24 = vector.extract_strided_slice %2 {offsets = [0, 3, 0], sizes = [2, 1, 16], strides = [1, 1, 1]} : vector<2x9x16xf32> to vector<2x1x16xf32>
    %25 = vector.broadcast %23 : vector<2x9x1xf32> to vector<2x9x16xf32>
    %26 = vector.broadcast %24 : vector<2x1x16xf32> to vector<2x9x16xf32>
    %27 = arith.mulf %25, %26 : vector<2x9x16xf32>
    %28 = arith.addf %22, %27 : vector<2x9x16xf32>
    %29 = vector.extract_strided_slice %1 {offsets = [0, 0, 4], sizes = [2, 9, 1], strides = [1, 1, 1]} : vector<2x9x9xf32> to vector<2x9x1xf32>
    %30 = vector.extract_strided_slice %2 {offsets = [0, 4, 0], sizes = [2, 1, 16], strides = [1, 1, 1]} : vector<2x9x16xf32> to vector<2x1x16xf32>
    %31 = vector.broadcast %29 : vector<2x9x1xf32> to vector<2x9x16xf32>
    %32 = vector.broadcast %30 : vector<2x1x16xf32> to vector<2x9x16xf32>
    %33 = arith.mulf %31, %32 : vector<2x9x16xf32>
    %34 = arith.addf %28, %33 : vector<2x9x16xf32>
    %35 = vector.extract_strided_slice %1 {offsets = [0, 0, 5], sizes = [2, 9, 1], strides = [1, 1, 1]} : vector<2x9x9xf32> to vector<2x9x1xf32>
    %36 = vector.extract_strided_slice %2 {offsets = [0, 5, 0], sizes = [2, 1, 16], strides = [1, 1, 1]} : vector<2x9x16xf32> to vector<2x1x16xf32>
    %37 = vector.broadcast %35 : vector<2x9x1xf32> to vector<2x9x16xf32>
    %38 = vector.broadcast %36 : vector<2x1x16xf32> to vector<2x9x16xf32>
    %39 = arith.mulf %37, %38 : vector<2x9x16xf32>
    %40 = arith.addf %34, %39 : vector<2x9x16xf32>
    %41 = vector.extract_strided_slice %1 {offsets = [0, 0, 6], sizes = [2, 9, 1], strides = [1, 1, 1]} : vector<2x9x9xf32> to vector<2x9x1xf32>
    %42 = vector.extract_strided_slice %2 {offsets = [0, 6, 0], sizes = [2, 1, 16], strides = [1, 1, 1]} : vector<2x9x16xf32> to vector<2x1x16xf32>
    %43 = vector.broadcast %41 : vector<2x9x1xf32> to vector<2x9x16xf32>
    %44 = vector.broadcast %42 : vector<2x1x16xf32> to vector<2x9x16xf32>
    %45 = arith.mulf %43, %44 : vector<2x9x16xf32>
    %46 = arith.addf %40, %45 : vector<2x9x16xf32>
    %47 = vector.extract_strided_slice %1 {offsets = [0, 0, 7], sizes = [2, 9, 1], strides = [1, 1, 1]} : vector<2x9x9xf32> to vector<2x9x1xf32>
    %48 = vector.extract_strided_slice %2 {offsets = [0, 7, 0], sizes = [2, 1, 16], strides = [1, 1, 1]} : vector<2x9x16xf32> to vector<2x1x16xf32>
    %49 = vector.broadcast %47 : vector<2x9x1xf32> to vector<2x9x16xf32>
    %50 = vector.broadcast %48 : vector<2x1x16xf32> to vector<2x9x16xf32>
    %51 = arith.mulf %49, %50 : vector<2x9x16xf32>
    %52 = arith.addf %46, %51 : vector<2x9x16xf32>
    %53 = vector.extract_strided_slice %1 {offsets = [0, 0, 8], sizes = [2, 9, 1], strides = [1, 1, 1]} : vector<2x9x9xf32> to vector<2x9x1xf32>
    %54 = vector.extract_strided_slice %2 {offsets = [0, 8, 0], sizes = [2, 1, 16], strides = [1, 1, 1]} : vector<2x9x16xf32> to vector<2x1x16xf32>
    %55 = vector.broadcast %53 : vector<2x9x1xf32> to vector<2x9x16xf32>
    %56 = vector.broadcast %54 : vector<2x1x16xf32> to vector<2x9x16xf32>
    %57 = arith.mulf %55, %56 : vector<2x9x16xf32>
    %58 = arith.addf %52, %57 : vector<2x9x16xf32>
    %59 = vector.shape_cast %58 : vector<2x9x16xf32> to vector<18x16xf32>
    %60 = arith.truncf %59 : vector<18x16xf32> to vector<18x16xbf16>
    %61 = arith.truncf %4 : vector<16x32xf32> to vector<16x32xbf16>
    %cst = arith.constant dense<0.000000e+00> : vector<18x32xf32>
    %62 = tpu.matmul %60, %61, %cst {dimension_numbers = #tpu.dot_dimension_numbers<[1], [0], [0], [1], [0, 0, 1, 1], [], []>} : vector<18x16xbf16>, vector<16x32xbf16>, vector<18x32xf32> -> vector<18x32xf32>
    %63 = vector.shape_cast %62 : vector<18x32xf32> to vector<2x9x32xf32>
    %64 = vector.shape_cast %5 : vector<1x32xf32> to vector<1x1x32xf32>
    %65 = vector.broadcast %64 : vector<1x1x32xf32> to vector<2x9x32xf32>
    %66 = arith.addf %63, %65 : vector<2x9x32xf32>
    %cst_7 = arith.constant 0.000000e+00 : f32
    %67 = vector.broadcast %cst_7 : f32 to vector<2x9x32xf32>
    %68 = arith.maximumf %66, %67 : vector<2x9x32xf32>
    %c0_8 = arith.constant 0 : index
    %c0_9 = arith.constant 0 : index
    %69 = vector.load %arg5[%c0_8, %c0_9] : memref<40x16xf32, #tpu.memory_space<vmem>>, vector<40x16xf32>
    %70 = vector.extract_strided_slice %69 {offsets = [0, 0], sizes = [32, 16], strides = [1, 1]} : vector<40x16xf32> to vector<32x16xf32>
    %71 = vector.extract_strided_slice %69 {offsets = [32, 0], sizes = [1, 16], strides = [1, 1]} : vector<40x16xf32> to vector<1x16xf32>
    %72 = vector.extract_strided_slice %1 {offsets = [0, 0, 0], sizes = [2, 9, 1], strides = [1, 1, 1]} : vector<2x9x9xf32> to vector<2x9x1xf32>
    %73 = vector.extract_strided_slice %68 {offsets = [0, 0, 0], sizes = [2, 1, 32], strides = [1, 1, 1]} : vector<2x9x32xf32> to vector<2x1x32xf32>
    %74 = vector.broadcast %72 : vector<2x9x1xf32> to vector<2x9x32xf32>
    %75 = vector.broadcast %73 : vector<2x1x32xf32> to vector<2x9x32xf32>
    %76 = arith.mulf %74, %75 : vector<2x9x32xf32>
    %77 = vector.extract_strided_slice %1 {offsets = [0, 0, 1], sizes = [2, 9, 1], strides = [1, 1, 1]} : vector<2x9x9xf32> to vector<2x9x1xf32>
    %78 = vector.extract_strided_slice %68 {offsets = [0, 1, 0], sizes = [2, 1, 32], strides = [1, 1, 1]} : vector<2x9x32xf32> to vector<2x1x32xf32>
    %79 = vector.broadcast %77 : vector<2x9x1xf32> to vector<2x9x32xf32>
    %80 = vector.broadcast %78 : vector<2x1x32xf32> to vector<2x9x32xf32>
    %81 = arith.mulf %79, %80 : vector<2x9x32xf32>
    %82 = arith.addf %76, %81 : vector<2x9x32xf32>
    %83 = vector.extract_strided_slice %1 {offsets = [0, 0, 2], sizes = [2, 9, 1], strides = [1, 1, 1]} : vector<2x9x9xf32> to vector<2x9x1xf32>
    %84 = vector.extract_strided_slice %68 {offsets = [0, 2, 0], sizes = [2, 1, 32], strides = [1, 1, 1]} : vector<2x9x32xf32> to vector<2x1x32xf32>
    %85 = vector.broadcast %83 : vector<2x9x1xf32> to vector<2x9x32xf32>
    %86 = vector.broadcast %84 : vector<2x1x32xf32> to vector<2x9x32xf32>
    %87 = arith.mulf %85, %86 : vector<2x9x32xf32>
    %88 = arith.addf %82, %87 : vector<2x9x32xf32>
    %89 = vector.extract_strided_slice %1 {offsets = [0, 0, 3], sizes = [2, 9, 1], strides = [1, 1, 1]} : vector<2x9x9xf32> to vector<2x9x1xf32>
    %90 = vector.extract_strided_slice %68 {offsets = [0, 3, 0], sizes = [2, 1, 32], strides = [1, 1, 1]} : vector<2x9x32xf32> to vector<2x1x32xf32>
    %91 = vector.broadcast %89 : vector<2x9x1xf32> to vector<2x9x32xf32>
    %92 = vector.broadcast %90 : vector<2x1x32xf32> to vector<2x9x32xf32>
    %93 = arith.mulf %91, %92 : vector<2x9x32xf32>
    %94 = arith.addf %88, %93 : vector<2x9x32xf32>
    %95 = vector.extract_strided_slice %1 {offsets = [0, 0, 4], sizes = [2, 9, 1], strides = [1, 1, 1]} : vector<2x9x9xf32> to vector<2x9x1xf32>
    %96 = vector.extract_strided_slice %68 {offsets = [0, 4, 0], sizes = [2, 1, 32], strides = [1, 1, 1]} : vector<2x9x32xf32> to vector<2x1x32xf32>
    %97 = vector.broadcast %95 : vector<2x9x1xf32> to vector<2x9x32xf32>
    %98 = vector.broadcast %96 : vector<2x1x32xf32> to vector<2x9x32xf32>
    %99 = arith.mulf %97, %98 : vector<2x9x32xf32>
    %100 = arith.addf %94, %99 : vector<2x9x32xf32>
    %101 = vector.extract_strided_slice %1 {offsets = [0, 0, 5], sizes = [2, 9, 1], strides = [1, 1, 1]} : vector<2x9x9xf32> to vector<2x9x1xf32>
    %102 = vector.extract_strided_slice %68 {offsets = [0, 5, 0], sizes = [2, 1, 32], strides = [1, 1, 1]} : vector<2x9x32xf32> to vector<2x1x32xf32>
    %103 = vector.broadcast %101 : vector<2x9x1xf32> to vector<2x9x32xf32>
    %104 = vector.broadcast %102 : vector<2x1x32xf32> to vector<2x9x32xf32>
    %105 = arith.mulf %103, %104 : vector<2x9x32xf32>
    %106 = arith.addf %100, %105 : vector<2x9x32xf32>
    %107 = vector.extract_strided_slice %1 {offsets = [0, 0, 6], sizes = [2, 9, 1], strides = [1, 1, 1]} : vector<2x9x9xf32> to vector<2x9x1xf32>
    %108 = vector.extract_strided_slice %68 {offsets = [0, 6, 0], sizes = [2, 1, 32], strides = [1, 1, 1]} : vector<2x9x32xf32> to vector<2x1x32xf32>
    %109 = vector.broadcast %107 : vector<2x9x1xf32> to vector<2x9x32xf32>
    %110 = vector.broadcast %108 : vector<2x1x32xf32> to vector<2x9x32xf32>
    %111 = arith.mulf %109, %110 : vector<2x9x32xf32>
    %112 = arith.addf %106, %111 : vector<2x9x32xf32>
    %113 = vector.extract_strided_slice %1 {offsets = [0, 0, 7], sizes = [2, 9, 1], strides = [1, 1, 1]} : vector<2x9x9xf32> to vector<2x9x1xf32>
    %114 = vector.extract_strided_slice %68 {offsets = [0, 7, 0], sizes = [2, 1, 32], strides = [1, 1, 1]} : vector<2x9x32xf32> to vector<2x1x32xf32>
    %115 = vector.broadcast %113 : vector<2x9x1xf32> to vector<2x9x32xf32>
    %116 = vector.broadcast %114 : vector<2x1x32xf32> to vector<2x9x32xf32>
    %117 = arith.mulf %115, %116 : vector<2x9x32xf32>
    %118 = arith.addf %112, %117 : vector<2x9x32xf32>
    %119 = vector.extract_strided_slice %1 {offsets = [0, 0, 8], sizes = [2, 9, 1], strides = [1, 1, 1]} : vector<2x9x9xf32> to vector<2x9x1xf32>
    %120 = vector.extract_strided_slice %68 {offsets = [0, 8, 0], sizes = [2, 1, 32], strides = [1, 1, 1]} : vector<2x9x32xf32> to vector<2x1x32xf32>
    %121 = vector.broadcast %119 : vector<2x9x1xf32> to vector<2x9x32xf32>
    %122 = vector.broadcast %120 : vector<2x1x32xf32> to vector<2x9x32xf32>
    %123 = arith.mulf %121, %122 : vector<2x9x32xf32>
    %124 = arith.addf %118, %123 : vector<2x9x32xf32>
    %125 = vector.shape_cast %124 : vector<2x9x32xf32> to vector<18x32xf32>
    %126 = arith.truncf %125 : vector<18x32xf32> to vector<18x32xbf16>
    %127 = arith.truncf %70 : vector<32x16xf32> to vector<32x16xbf16>
    %cst_10 = arith.constant dense<0.000000e+00> : vector<18x16xf32>
    %128 = tpu.matmul %126, %127, %cst_10 {dimension_numbers = #tpu.dot_dimension_numbers<[1], [0], [0], [1], [0, 0, 1, 1], [], []>} : vector<18x32xbf16>, vector<32x16xbf16>, vector<18x16xf32> -> vector<18x16xf32>
    %129 = vector.shape_cast %128 : vector<18x16xf32> to vector<2x9x16xf32>
    %130 = vector.shape_cast %71 : vector<1x16xf32> to vector<1x1x16xf32>
    %131 = vector.broadcast %130 : vector<1x1x16xf32> to vector<2x9x16xf32>
    %132 = arith.addf %129, %131 : vector<2x9x16xf32>
    %cst_11 = arith.constant 0.000000e+00 : f32
    %133 = vector.broadcast %cst_11 : f32 to vector<2x9x16xf32>
    %134 = arith.maximumf %132, %133 : vector<2x9x16xf32>
    %c0_12 = arith.constant 0 : index
    %c0_13 = arith.constant 0 : index
    %135 = vector.load %arg6[%c0_12, %c0_13] : memref<64x50xf32, #tpu.memory_space<vmem>>, vector<64x50xf32>
    %136 = vector.extract_strided_slice %135 {offsets = [0, 0], sizes = [16, 50], strides = [1, 1]} : vector<64x50xf32> to vector<16x50xf32>
    %137 = vector.extract_strided_slice %135 {offsets = [16, 0], sizes = [16, 50], strides = [1, 1]} : vector<64x50xf32> to vector<16x50xf32>
    %138 = vector.extract_strided_slice %135 {offsets = [32, 0], sizes = [16, 50], strides = [1, 1]} : vector<64x50xf32> to vector<16x50xf32>
    %139 = vector.extract_strided_slice %135 {offsets = [48, 0], sizes = [1, 50], strides = [1, 1]} : vector<64x50xf32> to vector<1x50xf32>
    %140 = vector.extract_strided_slice %135 {offsets = [56, 0], sizes = [1, 50], strides = [1, 1]} : vector<64x50xf32> to vector<1x50xf32>
    %cst_14 = arith.constant dense<0.000000e+00> : vector<2x16xf32>
    %141 = vector.multi_reduction <add>, %134, %cst_14 [1] : vector<2x9x16xf32> to vector<2x16xf32>
    %cst_15 = arith.constant 0.111111112 : f32
    %142 = vector.broadcast %cst_15 : f32 to vector<2x16xf32>
    %143 = arith.mulf %141, %142 : vector<2x16xf32>
    %144 = vector.extract_strided_slice %134 {offsets = [0, 8, 0], sizes = [2, 1, 16], strides = [1, 1, 1]} : vector<2x9x16xf32> to vector<2x1x16xf32>
    %145 = vector.shape_cast %144 : vector<2x1x16xf32> to vector<2x16xf32>
    %cst_16 = arith.constant dense<0.000000e+00> : vector<2x50xf32>
    %146 = tpu.matmul %143, %137, %cst_16 {dimension_numbers = #tpu.dot_dimension_numbers<[1], [0], [0], [1], [0, 0, 1, 1], [], []>} : vector<2x16xf32>, vector<16x50xf32>, vector<2x50xf32> -> vector<2x50xf32>
    %cst_17 = arith.constant dense<0.000000e+00> : vector<2x50xf32>
    %147 = tpu.matmul %145, %138, %cst_17 {dimension_numbers = #tpu.dot_dimension_numbers<[1], [0], [0], [1], [0, 0, 1, 1], [], []>} : vector<2x16xf32>, vector<16x50xf32>, vector<2x50xf32> -> vector<2x50xf32>
    %148 = arith.addf %146, %147 : vector<2x50xf32>
    %149 = vector.broadcast %140 : vector<1x50xf32> to vector<2x50xf32>
    %150 = arith.addf %148, %149 : vector<2x50xf32>
    %151 = vector.shape_cast %134 : vector<2x9x16xf32> to vector<18x16xf32>
    %152 = arith.truncf %151 : vector<18x16xf32> to vector<18x16xbf16>
    %153 = arith.truncf %136 : vector<16x50xf32> to vector<16x50xbf16>
    %cst_18 = arith.constant dense<0.000000e+00> : vector<18x50xf32>
    %154 = tpu.matmul %152, %153, %cst_18 {dimension_numbers = #tpu.dot_dimension_numbers<[1], [0], [0], [1], [0, 0, 1, 1], [], []>} : vector<18x16xbf16>, vector<16x50xbf16>, vector<18x50xf32> -> vector<18x50xf32>
    %155 = vector.shape_cast %154 : vector<18x50xf32> to vector<2x9x50xf32>
    %c0_19 = arith.constant 0 : index
    %c0_20 = arith.constant 0 : index
    %c0_21 = arith.constant 0 : index
    %156 = vector.load %arg3[%c0_19, %c0_20, %c0_21] : memref<2x8x24xf32, #tpu.memory_space<vmem>>, vector<2x8x24xf32>
    %157 = vector.extract_strided_slice %156 {offsets = [0, 0, 18], sizes = [2, 8, 1], strides = [1, 1, 1]} : vector<2x8x24xf32> to vector<2x8x1xf32>
    %158 = vector.extract_strided_slice %155 {offsets = [0, 0, 0], sizes = [2, 8, 50], strides = [1, 1, 1]} : vector<2x9x50xf32> to vector<2x8x50xf32>
    %159 = vector.shape_cast %150 : vector<2x50xf32> to vector<2x1x50xf32>
    %160 = vector.broadcast %159 : vector<2x1x50xf32> to vector<2x8x50xf32>
    %161 = arith.addf %158, %160 : vector<2x8x50xf32>
    %162 = vector.shape_cast %139 : vector<1x50xf32> to vector<1x1x50xf32>
    %163 = vector.broadcast %157 : vector<2x8x1xf32> to vector<2x8x50xf32>
    %164 = vector.broadcast %162 : vector<1x1x50xf32> to vector<2x8x50xf32>
    %165 = arith.mulf %163, %164 : vector<2x8x50xf32>
    %166 = arith.addf %161, %165 : vector<2x8x50xf32>
    %cst_22 = arith.constant 0.000000e+00 : f32
    %167 = vector.broadcast %cst_22 : f32 to vector<2x8x50xf32>
    %168 = arith.maximumf %166, %167 : vector<2x8x50xf32>
    %c0_23 = arith.constant 0 : index
    %c0_24 = arith.constant 0 : index
    %169 = vector.load %arg7[%c0_23, %c0_24] : memref<120x50xf32, #tpu.memory_space<vmem>>, vector<120x50xf32>
    %170 = vector.extract_strided_slice %169 {offsets = [0, 0], sizes = [24, 50], strides = [1, 1]} : vector<120x50xf32> to vector<24x50xf32>
    %171 = vector.extract_strided_slice %169 {offsets = [24, 0], sizes = [50, 50], strides = [1, 1]} : vector<120x50xf32> to vector<50x50xf32>
    %172 = vector.extract_strided_slice %169 {offsets = [80, 0], sizes = [1, 50], strides = [1, 1]} : vector<120x50xf32> to vector<1x50xf32>
    %173 = vector.extract_strided_slice %169 {offsets = [88, 0], sizes = [1, 50], strides = [1, 1]} : vector<120x50xf32> to vector<1x50xf32>
    %174 = vector.extract_strided_slice %169 {offsets = [96, 0], sizes = [1, 50], strides = [1, 1]} : vector<120x50xf32> to vector<1x50xf32>
    %175 = vector.extract_strided_slice %169 {offsets = [104, 0], sizes = [1, 50], strides = [1, 1]} : vector<120x50xf32> to vector<1x50xf32>
    %176 = vector.extract_strided_slice %169 {offsets = [112, 0], sizes = [1, 1], strides = [1, 1]} : vector<120x50xf32> to vector<1x1xf32>
    %177 = vector.shape_cast %156 : vector<2x8x24xf32> to vector<16x24xf32>
    %cst_25 = arith.constant dense<0.000000e+00> : vector<16x50xf32>
    %178 = tpu.matmul %177, %170, %cst_25 {dimension_numbers = #tpu.dot_dimension_numbers<[1], [0], [0], [1], [0, 0, 1, 1], [], []>} : vector<16x24xf32>, vector<24x50xf32>, vector<16x50xf32> -> vector<16x50xf32>
    %179 = vector.broadcast %172 : vector<1x50xf32> to vector<16x50xf32>
    %180 = arith.addf %178, %179 : vector<16x50xf32>
    %cst_26 = arith.constant 0.000000e+00 : f32
    %181 = vector.broadcast %cst_26 : f32 to vector<16x50xf32>
    %182 = arith.maximumf %180, %181 : vector<16x50xf32>
    %cst_27 = arith.constant dense<0.000000e+00> : vector<16x50xf32>
    %183 = tpu.matmul %182, %171, %cst_27 {dimension_numbers = #tpu.dot_dimension_numbers<[1], [0], [0], [1], [0, 0, 1, 1], [], []>} : vector<16x50xf32>, vector<50x50xf32>, vector<16x50xf32> -> vector<16x50xf32>
    %184 = vector.broadcast %173 : vector<1x50xf32> to vector<16x50xf32>
    %185 = arith.addf %183, %184 : vector<16x50xf32>
    %cst_28 = arith.constant 0.000000e+00 : f32
    %186 = vector.broadcast %cst_28 : f32 to vector<16x50xf32>
    %187 = arith.maximumf %185, %186 : vector<16x50xf32>
    %188 = vector.shape_cast %187 : vector<16x50xf32> to vector<2x8x50xf32>
    %189 = vector.shape_cast %175 : vector<1x50xf32> to vector<1x1x50xf32>
    %190 = vector.broadcast %189 : vector<1x1x50xf32> to vector<2x8x50xf32>
    %191 = arith.mulf %168, %190 : vector<2x8x50xf32>
    %192 = vector.shape_cast %174 : vector<1x50xf32> to vector<1x1x50xf32>
    %193 = vector.broadcast %192 : vector<1x1x50xf32> to vector<2x8x50xf32>
    %194 = arith.mulf %188, %193 : vector<2x8x50xf32>
    %195 = arith.addf %191, %194 : vector<2x8x50xf32>
    %cst_29 = arith.constant dense<0.000000e+00> : vector<2x8xf32>
    %196 = vector.multi_reduction <add>, %195, %cst_29 [2] : vector<2x8x50xf32> to vector<2x8xf32>
    %197 = vector.broadcast %176 : vector<1x1xf32> to vector<2x8xf32>
    %198 = arith.addf %196, %197 : vector<2x8xf32>
    %199 = vector.shape_cast %198 : vector<2x8xf32> to vector<1x1x16xf32>
    %c0_30 = arith.constant 0 : index
    %c0_31 = arith.constant 0 : index
    %c0_32 = arith.constant 0 : index
    %200 = vector.load %arg8[%c0_30, %c0_31, %c0_32] : memref<1x1x16xf32, #tpu.memory_space<vmem>>, vector<1x1x16xf32>
    tpu.vector_store %arg8[%c0_30, %c0_31, %c0_32], %199 {strides = array<i32>} : memref<1x1x16xf32, #tpu.memory_space<vmem>>, vector<1x1x16xf32>,
    return
  }
  func.func @transform_0(%arg0: i32) -> (i32, i32, i32) {
    %c0_i32 = arith.constant 0 : i32
    %c0_i32_0 = arith.constant 0 : i32
    %c0_i32_1 = arith.constant 0 : i32
    return %arg0, %c0_i32, %c0_i32_0 : i32, i32, i32
  }
  func.func @transform_1(%arg0: i32) -> (i32, i32, i32) {
    %c0_i32 = arith.constant 0 : i32
    %c0_i32_0 = arith.constant 0 : i32
    %c0_i32_1 = arith.constant 0 : i32
    return %arg0, %c0_i32, %c0_i32_0 : i32, i32, i32
  }
  func.func @transform_2(%arg0: i32) -> (i32, i32, i32) {
    %c0_i32 = arith.constant 0 : i32
    %c0_i32_0 = arith.constant 0 : i32
    %c0_i32_1 = arith.constant 0 : i32
    return %arg0, %c0_i32, %c0_i32_0 : i32, i32, i32
  }
  func.func @transform_3(%arg0: i32) -> (i32, i32) {
    %c0_i32 = arith.constant 0 : i32
    %c0_i32_0 = arith.constant 0 : i32
    %c0_i32_1 = arith.constant 0 : i32
    return %c0_i32, %c0_i32_0 : i32, i32
  }
  func.func @transform_4(%arg0: i32) -> (i32, i32) {
    %c0_i32 = arith.constant 0 : i32
    %c0_i32_0 = arith.constant 0 : i32
    %c0_i32_1 = arith.constant 0 : i32
    return %c0_i32, %c0_i32_0 : i32, i32
  }
  func.func @transform_5(%arg0: i32) -> (i32, i32) {
    %c0_i32 = arith.constant 0 : i32
    %c0_i32_0 = arith.constant 0 : i32
    %c0_i32_1 = arith.constant 0 : i32
    return %c0_i32, %c0_i32_0 : i32, i32
  }
  func.func @transform_6(%arg0: i32) -> (i32, i32) {
    %c0_i32 = arith.constant 0 : i32
    %c0_i32_0 = arith.constant 0 : i32
    %c0_i32_1 = arith.constant 0 : i32
    return %c0_i32, %c0_i32_0 : i32, i32
  }
  func.func @transform_7(%arg0: i32) -> (i32, i32, i32) {
    %c0_i32 = arith.constant 0 : i32
    %c0_i32_0 = arith.constant 0 : i32
    %c0_i32_1 = arith.constant 0 : i32
    return %arg0, %c0_i32, %c0_i32_0 : i32, i32, i32
  }
}

</mosaic_0001>

<bundles_post_ra>
// kernel: tpu_custom_call.1
= control target key start
LH: loop header
LB: loop body
LE: loop exit
PB: predicated region body
PF: predicated region fallthrough
CT: control target
= control target key end

     0   :  { %v3368_v1 = vmov 2   ;;  %v3369_v2 = vmov 0   ;;  %s4267_s0 = inlined_call_operand.vmem [shape: bf16[2,9,9], index: 0, kind: input, shape index: {}]   ;;  %s4268_s1 = inlined_call_operand.vmem [shape: f32[2,9,16], index: 1, kind: input, shape index: {}]   ;;  %s4269_s2 = inlined_call_operand.vmem [shape: f32[2,8,24], index: 2, kind: input, shape index: {}]   ;;  %s4270_s3 = inlined_call_operand.vmem [shape: f32[24,32], index: 3, kind: input, shape index: {}]   ;;  %s4271_s4 = inlined_call_operand.vmem [shape: f32[40,16], index: 4, kind: input, shape index: {}]   ;;  %s4272_s5 = inlined_call_operand.vmem [shape: f32[64,50], index: 5, kind: input, shape index: {}]   ;;  %s4273_s6 = inlined_call_operand.vmem [shape: f32[120,50], index: 6, kind: input, shape index: {}]   ;;  %s4274_s7 = inlined_call_operand.hbm [shape: f32[1,1,16], index: 7, kind: output, shape index: {}]  }
   0x1   :  { %v28_v0 = vld [vmem:[%s4267_s0] ss:$8 sps:$4 sm:$0xff]   ;;  %3253 = vset.pattern.permute.xlu1 %v3368_v1  ;;  %3241 = vset.pattern.permute.xlu0 %v3369_v2  ;;  %v29_v5 = vld [vmem:[%s4267_s0 + $0x4] sm:$0x1]  ;;  %v31_v6 = vld [vmem:[%s4267_s0 + $0xc] sm:$0x1] }
   0x2   :  { %v32_v3 = vunpack.c.l.bf16 %v28_v0  ;;  %v34_v4 = vunpack.c.h.bf16 %v28_v0  ;;  %v33_v7 = vunpack.c.l.bf16 %v29_v5  ;;  %v35_v8 = vunpack.c.l.bf16 %v31_v6 }
   0x3   :  { %12 = vsyncpa [#allocation3], 0  ;;  %v3370_v11 = vmov 1   ;;  %v3371_v12 = vmov 3   ;;  %v3372_v13 = vmov 4   ;;  %v3373_v14 = vmov 7  }
   0x4   :  { %v3254_v9 = vpack.i.bf16 %v34_v4, %v32_v3  ;;  %v3260_v10 = vpack.i.bf16 %v35_v8, %v33_v7  ;;  %v3374_v15 = vmov 5   ;;  %v3375_v16 = vmov 6   ;;  %v40_v18 = vld [vmem:[%s4270_s3] sm:$0xff]  ;;  %v41_v19 = vld [vmem:[%s4270_s3 + $0x8] sm:$0xff]  ;;  %v3463_v31 = vld [vmem:[%s4268_s1 + $0x10] sm:$0xff]  ;;  %s3382_s22 = smov [#allocation2]  }
   0x5   :  { %v3376_v17 = vmov 8   ;;  %v579_v20 = vpack.c.bf16 %v41_v19, %v40_v18  ;;  %v4275_v24 = vlaneseq  ;;  %v3458_v30 = vld [vmem:[%s4268_s1] sm:$0xff]  ;;  %vm580_vm0 = vcmask 130048   ;;  %s3085_s23 = sshll.u32 %s3382_s22, 4  ;;  %s3086_s23 = int_to_ptr.vmem [resolvable:$true] %s3085_s23 }
   0x6   :  { %3255 = vperm.xlu1 %3253, %v3254_v9   ;;  %3243 = vperm.xlu0 %3241, %v3254_v9   ;;  %vm1305_vm1 = vcmask 261120   ;;  %vm3379_vm2 = vmmov 0   ;;  %vm1756_vm3 = vcmask 122880   ;;  %vm1865_vm4 = vcmask 1041409   ;;  %s3344_s24 = scalar_lea.vmem %s3086_s23, 16  ;;  %s3348_s25 = scalar_lea.vmem %s3086_s23, 32 }
   0x7   :  { %3142 = vmatprep.subr.bf16.mxu1 %v579_v20  ;;  %v3445_v25 = vshrl.u32 %v4275_v24, 7  ;;  %vm2544_vm5 = vcmask 195584   ;;  %vm2637_vm6 = vcmask 1041408   ;;  %vm2630_vm7 = vcmask 408576   ;;  %p3345_p0 = scmp.ne.s32.totalorder %s3086_s23, %s3344_s24  ;;  %p3349_p1 = scmp.lt.s32.totalorder %s3086_s23, %s3086_s23 }
   0x8   :  { %3143 = vmatpush3.bf16.msra.mxu1 %v579_v20  ;;  %vm3075_vm8 = vcmask 130112   ;;  %p3350_p2 = scmp.lt.s32.totalorder %s3348_s25, %s3344_s24 }
   0x9   :  { %v3452_v28 = vsub.s32 0, %v3445_v25  ;;  %v93_v29 = vsub.s32 1, %v3445_v25  ;;  %v125_v33 = vsub.s32 2, %v3445_v25  ;;  %v157_v39 = vsub.s32 3, %v3445_v25 }
   0xa   :  { %3259 = vset.pattern.permute.xlu1 %v3369_v2  ;;  %3247 = vset.pattern.permute.xlu0 %v3370_v11  ;;  %v189_v40 = vsub.s32 4, %v3445_v25  ;;  %v221_v45 = vsub.s32 5, %v3445_v25  ;;  %v253_v48 = vsub.s32 6, %v3445_v25  ;;  %p3351_p3 = por %p3350_p2, %p3349_p1 }
   0xb   :  { %3261 = vperm.xlu1 %3259, %v3260_v10   ;;  %3249 = vperm.xlu0 %3247, %v3254_v9   ;;  %v66_v34 = vrot.slane %v3458_v30, %v3452_v28  ;;  %v70_v35 = vrot.slane %v3463_v31, %v3452_v28  ;;  %v94_v37 = vrot.slane %v3458_v30, %v93_v29 }
   0xc   :  { %v98_v38 = vrot.slane %v3463_v31, %v93_v29  ;;  %v126_v46 = vrot.slane %v3458_v30, %v125_v33  ;;  %v130_v49 = vrot.slane %v3463_v31, %v125_v33  ;;  %v158_v50 = vrot.slane %v3458_v30, %v157_v39  ;;  %p3352_p4 = pnand %p3351_p3, %p3345_p0 }
   0xd   :  { %v162_v51 = vrot.slane %v3463_v31, %v157_v39  ;;  %v3491_v52 = vrot.slane %v3458_v30, %v189_v40  ;;  %v194_v60 = vrot.slane %v3463_v31, %v189_v40  ;;  %v3507_v61 = vrot.slane %v3458_v30, %v221_v45 }
   0xe   :  { %v3512_v0 = vrot.slane %v3463_v31, %v221_v45 }
   0xf   :  { %3265 = vset.pattern.permute.xlu1 %v3370_v11  ;;  %3271 = vset.pattern.permute.xlu0 %v3371_v12 }
  0x10   :  { %3267 = vperm.xlu1 %3265, %v3260_v10   ;;  %3273 = vperm.xlu0 %3271, %v3254_v9  }
  0x14   :  { %3277 = vset.pattern.permute.xlu1 %v3368_v1  ;;  %3290 = vperm.xlu0 %3271, %v3260_v10   ;;  %v3515_v1 = vrot.slane %v3458_v30, %v253_v48 }
  0x15   :  { %3279 = vperm.xlu1 %3277, %v3260_v10  }
  0x18   :  { %3300 = vset.pattern.permute.xlu0 %v3372_v13 }
  0x19   :  { %3283 = vset.pattern.permute.xlu1 %v3372_v13  ;;  %3302 = vperm.xlu0 %3300, %v3260_v10   ;;  %v285_v13 = vsub.s32 7, %v3445_v25 }
  0x1a   :  { %3285 = vperm.xlu1 %3283, %v3254_v9  }
  0x1d   :  { %3318 = vset.pattern.permute.xlu0 %v3373_v14 }
  0x1e   :  { %3294 = vset.pattern.permute.xlu1 %v3374_v15  ;;  %3320 = vperm.xlu0 %3318, %v3254_v9  }
  0x1f   :  { %3296 = vperm.xlu1 %3294, %v3254_v9  }
  0x22   :  { %3337 = vperm.xlu0 %3318, %v3260_v10  }
  0x23   :  { %3306 = vset.pattern.permute.xlu1 %v3375_v16 }
  0x24   :  { %3308 = vperm.xlu1 %3306, %v3254_v9  }
  0x26   :  { %3341 = vset.pattern.permute.xlu0 %v3376_v17 }
  0x27   :  { %312 = vperm.xlu0 %3341, %v35_v8  }
  0x28   :  { %3312 = vset.pattern.permute.xlu1 %v3374_v15 }
  0x29   :  { %3314 = vperm.xlu1 %3312, %v3260_v10  }
  0x2d   :  { %3324 = vset.pattern.permute.xlu1 %v3375_v16 }
  0x2e   :  { %3326 = vperm.xlu1 %3324, %v3260_v10  }
  0x32   :  { %3330 = vset.pattern.permute.xlu1 %v3376_v17 }
  0x33   :  { %3332 = vperm.xlu1 %3330, %v3254_v9  }
  0x37   :  { %304 = vperm.xlu1 %3330, %v33_v7  }
  0x85   :  { %v3438_v21 = vpop.permute.xlu1 %3255  ;;  %v3440_v22 = vpop.permute.xlu0 %3243 }
  0x86   :  { %v4296_v41 = vunpack.i.h.bf16 %v3440_v22  ;;  %v3245_v42 = vunpack.i.l.bf16 %v3440_v22  ;;  %v4284_v62 = vunpack.i.h.bf16 %v3438_v21  ;;  %v3257_v63 = vunpack.i.l.bf16 %v3438_v21 }
  0x88   :  { %v73_v53 = vmul.f32 %v4296_v41, %v70_v35  ;;  %v71_v54 = vmul.f32 %v3245_v42, %v66_v34  ;;  %v133_v14 = vmul.f32 %v4284_v62, %v130_v49  ;;  %v131_v15 = vmul.f32 %v3257_v63, %v126_v46 }
  0x8a   :  { %v3442_v23 = vpop.permute.xlu1 %3261  ;;  %v3447_v26 = vpop.permute.xlu0 %3249 }
  0x8b   :  { %v4286_v43 = vunpack.i.h.bf16 %v3447_v26  ;;  %v3251_v44 = vunpack.i.l.bf16 %v3447_v26  ;;  %v4295_v2 = vunpack.i.h.bf16 %v3442_v23  ;;  %v3263_v3 = vunpack.i.l.bf16 %v3442_v23 }
  0x8d   :  { %v101_v55 = vmul.f32 %v4286_v43, %v98_v38  ;;  %v99_v56 = vmul.f32 %v3251_v44, %v94_v37  ;;  %v74_v19 = vmul.f32 %v4295_v2, %v70_v35  ;;  %v72_v20 = vmul.f32 %v3263_v3, %v66_v34 }
  0x8f   :  { %v3449_v27 = vpop.permute.xlu1 %3267  ;;  %v3472_v36 = vpop.permute.xlu0 %3273  ;;  %v103_v7 = vadd.f32 %v99_v56, %v71_v54  ;;  %v105_v8 = vadd.f32 %v101_v55, %v73_v53  ;;  %v258_v55 = vrot.slane %v3463_v31, %v253_v48  ;;  %v286_v56 = vrot.slane %v3458_v30, %v285_v13 }
  0x90   :  { %v4285_v58 = vunpack.i.h.bf16 %v3449_v27  ;;  %v3269_v59 = vunpack.i.l.bf16 %v3449_v27  ;;  %v4278_v9 = vunpack.i.h.bf16 %v3472_v36  ;;  %v3275_v10 = vunpack.i.l.bf16 %v3472_v36 }
  0x91   :  { %v137_v39 = vadd.f32 %v133_v14, %v105_v8 }
  0x92   :  { %v102_v11 = vmul.f32 %v4285_v58, %v98_v38  ;;  %v100_v12 = vmul.f32 %v3269_v59, %v94_v37  ;;  %v165_v37 = vmul.f32 %v4278_v9, %v162_v51  ;;  %v135_v38 = vadd.f32 %v131_v15, %v103_v7  ;;  %v3094_v58 = vld [vmem:[%s4268_s1 + $0x18] ss:$0 sm:$0xff] }
  0x93   :  { %v3501_v57 = vpop.permute.xlu0 %3290  ;;  %v163_v40 = vmul.f32 %v3275_v10, %v158_v50 }
  0x94   :  { %v3465_v32 = vpop.permute.xlu1 %3279  ;;  %v4276_v16 = vunpack.i.h.bf16 %v3501_v57  ;;  %v3292_v17 = vunpack.i.l.bf16 %v3501_v57  ;;  %v104_v35 = vadd.f32 %v100_v12, %v72_v20  ;;  %v106_v53 = vadd.f32 %v102_v11, %v74_v19 }
  0x95   :  { %v4279_v4 = vunpack.i.h.bf16 %v3465_v32  ;;  %v3281_v5 = vunpack.i.l.bf16 %v3465_v32  ;;  %v3377_v20 = vmov 1966171168   ;;  %v167_v24 = vadd.f32 %v163_v40, %v135_v38 }
  0x96   :  { %v169_v48 = vadd.f32 %v165_v37, %v137_v39 }
  0x97   :  { %v134_v29 = vmul.f32 %v4279_v4, %v130_v49  ;;  %v132_v33 = vmul.f32 %v3281_v5, %v126_v46  ;;  %v166_v49 = vmul.f32 %v4276_v16, %v162_v51  ;;  %v164_v46 = vmul.f32 %v3292_v17, %v158_v50 }
  0x98   :  { %v3536_v18 = vpop.permute.xlu0 %3302  ;;  %v290_v51 = vrot.slane %v3463_v31, %v285_v13  ;;  %v337_v50 = vunpack.c.l.s4 %v3377_v20 }
  0x99   :  { %v3484_v47 = vpop.permute.xlu1 %3285  ;;  %v136_v8 = vadd.f32 %v132_v33, %v104_v35  ;;  %v138_v14 = vadd.f32 %v134_v29, %v106_v53  ;;  %v4283_v11 = vunpack.i.h.bf16 %v3536_v18  ;;  %v4300_v12 = vunpack.i.l.bf16 %v3536_v18 }
  0x9a   :  { %v4277_v34 = vunpack.i.h.bf16 %v3484_v47  ;;  %v3287_v54 = vunpack.i.l.bf16 %v3484_v47  ;;  %v338_v4 = vunpack.c.0.s8 %v337_v50 }
  0x9b   :  { %v170_v37 = vadd.f32 %v166_v49, %v138_v14  ;;  %v168_v38 = vadd.f32 %v164_v46, %v136_v8  ;;  %v198_v39 = vmul.f32 %v4283_v11, %v194_v60  ;;  %v196_v40 = vmul.f32 %v4300_v12, %v3491_v52 }
  0x9c   :  { %v197_v30 = vmul.f32 %v4277_v34, %v194_v60  ;;  %v195_v29 = vmul.f32 %v3287_v54, %v3491_v52 }
  0x9d   :  { %v3560_v7 = vpop.permute.xlu0 %3320 }
  0x9e   :  { %v3521_v6 = vpop.permute.xlu1 %3296  ;;  %v4287_v9 = vunpack.i.h.bf16 %v3560_v7  ;;  %v199_v49 = vadd.f32 %v195_v29, %v167_v24  ;;  %v201_v46 = vadd.f32 %v197_v30, %v169_v48  ;;  %v200_v48 = vadd.f32 %v196_v40, %v168_v38 }
  0x9f   :  { %v4280_v15 = vunpack.i.h.bf16 %v3521_v6  ;;  %v4299_v19 = vunpack.i.l.bf16 %v3521_v6  ;;  %v202_v30 = vadd.f32 %v198_v39, %v170_v37 }
  0xa0   :  { %v293_v11 = vmul.f32 %v4287_v9, %v290_v51 }
  0xa1   :  { %v3578_v13 = vpop.permute.xlu0 %3337  ;;  %v229_v20 = vmul.f32 %v4280_v15, %v3512_v0  ;;  %v227_v34 = vmul.f32 %v4299_v19, %v3507_v61  ;;  %v4293_v15 = vunpack.i.l.bf16 %v3560_v7 }
  0xa2   :  { %v4288_v8 = vunpack.i.h.bf16 %v3578_v13  ;;  %v4290_v62 = vunpack.i.l.bf16 %v3578_v13 }
  0xa3   :  { %v3550_v45 = vpop.permute.xlu1 %3308 }
  0xa4   :  { %v4282_v35 = vunpack.i.h.bf16 %v3550_v45  ;;  %v4297_v53 = vunpack.i.l.bf16 %v3550_v45  ;;  %v294_v38 = vmul.f32 %v4288_v8, %v290_v51 }
  0xa6   :  { %v261_v52 = vmul.f32 %v4282_v35, %v258_v55  ;;  %v259_v14 = vmul.f32 %v4297_v53, %v3515_v1  ;;  %v233_v35 = vadd.f32 %v229_v20, %v201_v46  ;;  %v291_v20 = vmul.f32 %v4293_v15, %v286_v56 }
  0xa8   :  { %v3572_v33 = vpop.permute.xlu1 %3314  ;;  %v265_v40 = vadd.f32 %v261_v52, %v233_v35  ;;  %v3637_v35 = vsub.s32 %v338_v4, %v3445_v25 }
  0xa9   :  { %v4281_v16 = vunpack.i.h.bf16 %v3572_v33  ;;  %v4298_v31 = vunpack.i.l.bf16 %v3572_v33 }
  0xab   :  { %v230_v60 = vmul.f32 %v4281_v16, %v3512_v0  ;;  %v228_v24 = vmul.f32 %v4298_v31, %v3507_v61  ;;  %v231_v16 = vadd.f32 %v227_v34, %v199_v49  ;;  %v3615_v61 = vpop.permute.xlu0 %312 }
  0xad   :  { %v3605_v50 = vpop.permute.xlu1 %3326  ;;  %v234_v43 = vadd.f32 %v230_v60, %v202_v30  ;;  %v263_v39 = vadd.f32 %v259_v14, %v231_v16  ;;  %v232_v49 = vadd.f32 %v228_v24, %v200_v48  ;;  %v326_v60 = vmul.f32 %v3094_v58, %v3615_v61 }
  0xae   :  { %v4289_v0 = vunpack.i.h.bf16 %v3605_v50  ;;  %v4294_v29 = vunpack.i.l.bf16 %v3605_v50  ;;  %v297_v14 = vadd.f32 %v293_v11, %v265_v40 }
  0xaf   :  { %v295_v52 = vadd.f32 %v291_v20, %v263_v39 }
  0xb0   :  { %v262_v37 = vmul.f32 %v4289_v0, %v258_v55  ;;  %v260_v34 = vmul.f32 %v4294_v29, %v3515_v1  ;;  %v3093_v55 = vld [vmem:[%s4268_s1 + $0x8] ss:$0 sm:$0xff]  ;;  %v292_v1 = vmul.f32 %v4290_v62, %v286_v56 }
  0xb2   :  { %v266_v46 = vadd.f32 %v262_v37, %v234_v43  ;;  %v3626_v9 = vpop.permute.xlu1 %3332  ;;  %v264_v30 = vadd.f32 %v260_v34, %v232_v49 }
  0xb3   :  { %v4291_v16 = vunpack.i.h.bf16 %v3626_v9  ;;  %v4292_v51 = vunpack.i.l.bf16 %v3626_v9 }
  0xb4   :  { %v298_v43 = vadd.f32 %v294_v38, %v266_v46  ;;  %v296_v49 = vadd.f32 %v292_v1, %v264_v30 }
  0xb5   :  { %v325_v24 = vmul.f32 %v4291_v16, %v3094_v58  ;;  %v323_v48 = vmul.f32 %v4292_v51, %v3093_v55 }
  0xb6   :  { %v330_v37 = vadd.f32 %v326_v60, %v298_v43  ;;  %v3643_v34 = vpop.permute.xlu1 %304 }
  0xb7   :  { %v329_v56 = vadd.f32 %v325_v24, %v297_v14  ;;  %v324_v8 = vmul.f32 %v3093_v55, %v3643_v34  ;;  %v327_v0 = vadd.f32 %v323_v48, %v295_v52 }
  0xb8   :  { %v453_v4 = vrot.slane %v330_v37, %v3637_v35 }
  0xb9   :  { %v398_v62 = vcombine.high %v329_v56, %v329_v56  ;;  %v405_v38 = vrot.slane %v329_v56, %v3637_v35  ;;  %v328_v11 = vadd.f32 %v324_v8, %v296_v49  ;;  %v335_v39 = vcombine.high %v327_v0, %v327_v0 }
  0xba   :  { %v342_v58 = vrot.slane %v327_v0, %v3637_v35  ;;  %v460_v30 = vrot.slane %v453_v4, %v3637_v35 }
  0xbb   :  { %v412_v40 = vrot.slane %v398_v62, %v3637_v35  ;;  %v413_v20 = vcombine.high %v405_v38, %v405_v38  ;;  %v421_v46 = vrot.slane %v405_v38, %v3637_v35  ;;  %v349_v60 = vrot.slane %v335_v39, %v3637_v35 }
  0xbc   :  { %v350_v55 = vcombine.high %v342_v58, %v342_v58  ;;  %v358_v1 = vrot.slane %v342_v58, %v3637_v35  ;;  %v390_v43 = vrot.slane %v328_v11, %v3637_v35 }
  0xbd   :  { %v414_v52 = vcombine.high %v412_v40, %v412_v40  ;;  %v428_v8 = vrot.slane %v412_v40, %v3637_v35  ;;  %v435_v14 = vrot.slane %v413_v20, %v3637_v35  ;;  %v443_v0 = vcombine.high %v421_v46, %v421_v46 }
  0xbe   :  { %v351_v24 = vcombine.high %v349_v60, %v349_v60  ;;  %v365_v62 = vrot.slane %v349_v60, %v3637_v35  ;;  %v372_v48 = vrot.slane %v350_v55, %v3637_v35  ;;  %v397_v37 = vrot.slane %v390_v43, %v3637_v35 }
  0xbf   :  { %v442_v56 = vrot.slane %v414_v52, %v3637_v35  ;;  %v444_v49 = vcombine.high %v428_v8, %v428_v8  ;;  %v445_v4 = vcombine.high %v435_v14, %v435_v14  ;;  %v511_v38 = vcombine.low %v435_v14, %v443_v0 }
  0xc0   :  { %v510_v39 = vcombine.low %v397_v37, %v421_v46  ;;  %v379_v11 = vrot.slane %v351_v24, %v3637_v35  ;;  %v461_v58 = vcombine.low %v358_v1, %v372_v48  ;;  %v3095_v40 = vcombine.high %v358_v1, %v372_v48 }
  0xc1   :  { %v446_v16 = vcombine.high %v442_v56, %v442_v56  ;;  %v512_v20 = vcombine.low %v445_v4, %v428_v8  ;;  %v513_v51 = vcombine.low %v442_v56, %v444_v49  ;;  %v527_v15 = vrot.slane %v511_v38, %v3637_v35 }
  0xc2   :  { %v463_v60 = vcombine.low %v365_v62, %v379_v11  ;;  %v3096_v29 = vcombine.high %v365_v62, %v379_v11  ;;  %v471_v55 = vrot.slane %v461_v58, %v3637_v35  ;;  %v478_v43 = vrot.slane %v3095_v40, %v3637_v35  ;;  %v876_v11 = vld [vmem:[%s4271_s4 + $0x10] sm:$0xff]  ;;  %v877_v40 = vld [vmem:[%s4271_s4 + $0x18] sm:$0xff] }
  0xc3   :  { %v559_v52 = vcombine.low %v446_v16, %v460_v30  ;;  %v520_v2 = vrot.slane %v510_v39, %v3637_v35  ;;  %v534_v46 = vrot.slane %v512_v20, %v3637_v35  ;;  %v541_v14 = vrot.slane %v513_v51, %v3637_v35 }
  0xc4   :  { %v485_v1 = vrot.slane %v463_v60, %v3637_v35  ;;  %v492_v8 = vrot.slane %v3096_v29, %v3637_v35  ;;  %v493_v0 = vcombine.low %v471_v55, %v478_v43  ;;  %v1304_v20 = vpack.c.bf16 %v877_v40, %v876_v11  ;;  %v42_v60 = vld [vmem:[%s4270_s3 + $0x10] sm:$0xff] }
  0xc5   :  { %v542_v24 = vcombine.low %v520_v2, %v527_v15  ;;  %v543_v48 = vcombine.low %v534_v46, %v541_v14  ;;  %v566_v62 = vrot.slane %v559_v52, %v3637_v35  ;;  %v874_v2 = vld [vmem:[%s4271_s4] sm:$0xff]  ;;  %v875_v15 = vld [vmem:[%s4271_s4 + $0x8] sm:$0xff]  ;;  %v779_v55 = vrot.slane %v42_v60, %v3452_v28 }
  0xc6   :  { %v494_v37 = vcombine.low %v485_v1, %v492_v8  ;;  %v501_v30 = vrot.slane %v493_v0, %v3637_v35  ;;  %v1303_v58 = vpack.c.bf16 %v875_v15, %v874_v2 }
  0xc7   :  { %v550_v56 = vrot.slane %v542_v24, %v3637_v35  ;;  %v557_v16 = vrot.slane %v543_v48, %v3637_v35  ;;  %v573_v51 = vrot.slane %v566_v62, %v3637_v35  ;;  %v781_v43 = vcombine.high %v779_v55, %v779_v55 }
  0xc8   :  { %v508_v49 = vrot.slane %v494_v37, %v3637_v35  ;;  %3148 = vmatprep.subr.bf16.mxu1 %v1303_v58  ;;  %v788_v52 = vrot.slane %v779_v55, %v3637_v35 }
  0xc9   :  { %v558_v4 = vcombine.low %v550_v56, %v557_v16  ;;  %v578_v39 = vpack.c.bf16 %v573_v51, %v573_v51  ;;  %v795_v46 = vrot.slane %v781_v43, %v3637_v35 }
  0xca   :  { %v509_v38 = vcombine.low %v501_v30, %v508_v49  ;;  %v796_v14 = vcombine.high %v788_v52, %v788_v52  ;;  %v3697_v0 = vrot.slane %v788_v52, %v3637_v35 }
  0xcb   :  { %v797_v1 = vcombine.high %v795_v46, %v795_v46  ;;  %v3707_v30 = vrot.slane %v795_v46, %v3637_v35 }
  0xcc   :  { %v577_v29 = vpack.c.bf16 %v558_v4, %v509_v38  ;;  %v3700_v48 = vrot.slane %v796_v14, %v3637_v35 }
  0xcd   :  { %v3704_v16 = vrot.slane %v797_v1, %v3637_v35  ;;  %v3726_v60 = vcombine.high %v3707_v30, %v3707_v30 }
  0xce   :  { %3144 = vmatprep.mubr.msk.bf16.mxu1 %vm580_vm0, %v577_v29  ;;  %v3718_v2 = vcombine.high %v3700_v48, %v3700_v48 }
  0xcf   :  { %3145 = vmatmul.mubr.msk.bf16.vlgmr.msra.gmra.mrb[0].mxu1 %vm580_vm0, %v578_v39  ;;  %v3714_v39 = vcombine.high %v3697_v0, %v3697_v0 }
  0xd0   :  { %3149 = vmatpush3.bf16.msra.mxu1 %v1303_v58 }
  0xd1   :  { %3150 = vmatprep.subr.bf16.mxu1 %v1304_v20 }
  0xd4   :  { %3151 = vmatpush3.bf16.msra.mxu1 %v1304_v20  ;;  %v829_v20 = vcombine.high %v3704_v16, %v3704_v16 }
 0x1a2   :  { %v3146_v8 = vpop.f32.mrb[0].mxu1 }
 0x1a3   :  { %v621_v24 = vpop.f32.mrb[1].mxu1  ;;  %v742_v4 = vrot.slane %v3146_v8, %v3637_v35 }
 0x1a4   :  { %v638_v62 = vcombine.high %v621_v24, %v621_v24  ;;  %v645_v37 = vrot.slane %v621_v24, %v3637_v35  ;;  %v3147_v56 = vpop.f32.mrb[2].mxu1 }
 0x1a5   :  { %v624_v49 = vpop.f32.mrb[3].mxu1  ;;  %v743_v43 = vcombine.high %v742_v4, %v742_v4  ;;  %v750_v1 = vrot.slane %v742_v4, %v3637_v35 }
 0x1a6   :  { %v652_v51 = vrot.slane %v638_v62, %v3637_v35  ;;  %v653_v38 = vcombine.high %v645_v37, %v645_v37  ;;  %v661_v29 = vrot.slane %v645_v37, %v3637_v35  ;;  %v687_v56 = vcombine.high %v624_v49, %v624_v49 }
 0x1a7   :  { %v757_v31 = vrot.slane %v743_v43, %v3637_v35 }
 0x1a8   :  { %v654_v15 = vcombine.high %v652_v51, %v652_v51  ;;  %v668_v11 = vrot.slane %v652_v51, %v3637_v35  ;;  %v675_v58 = vrot.slane %v653_v38, %v3637_v35  ;;  %v683_v40 = vcombine.high %v661_v29, %v661_v29 }
 0x1a9   :  { %v838_v55 = vadd.f32 %v3697_v0, %v661_v29  ;;  %v701_v12 = vrot.slane %v687_v56, %v3637_v35 }
 0x1aa   :  { %v682_v52 = vrot.slane %v654_v15, %v3637_v35  ;;  %v685_v46 = vcombine.high %v675_v58, %v675_v58  ;;  %v839_v14 = vadd.f32 %v3700_v48, %v675_v58  ;;  %v684_v8 = vcombine.high %v668_v11, %v668_v11 }
 0x1ab   :  { %v840_v24 = vadd.f32 %v3714_v39, %v683_v40  ;;  %v842_v62 = vadd.f32 %v3707_v30, %v668_v11  ;;  %v856_v29 = vmax.f32 %v838_v55, 0.0  ;;  %v3737_v58 = vadd.f32 %v829_v20, %v750_v1 }
 0x1ac   :  { %v841_v37 = vadd.f32 %v3718_v2, %v685_v46  ;;  %v686_v51 = vcombine.high %v682_v52, %v682_v52  ;;  %v843_v38 = vadd.f32 %v3704_v16, %v682_v52  ;;  %v857_v41 = vmax.f32 %v839_v14, 0.0 }
 0x1ad   :  { %v858_v53 = vmax.f32 %v840_v24, 0.0  ;;  %v844_v4 = vadd.f32 %v3726_v60, %v684_v8  ;;  %v860_v19 = vmax.f32 %v842_v62, 0.0  ;;  %v884_v40 = vrot.slane %v856_v29, %v3452_v28 }
 0x1ae   :  { %v859_v15 = vmax.f32 %v841_v37, 0.0  ;;  %v900_v11 = vrot.slane %v857_v41, %v3452_v28  ;;  %v694_v46 = vrot.slane %v624_v49, %v3637_v35  ;;  %v845_v52 = vadd.f32 %v829_v20, %v686_v51 }
 0x1af   :  { %v861_v55 = vmax.f32 %v843_v38, 0.0  ;;  %v920_v14 = vrot.slane %v858_v53, %v3452_v28  ;;  %v891_v43 = vmul.f32 %v3245_v42, %v884_v40  ;;  %v892_v1 = vmul.f32 %v3263_v3, %v884_v40 }
 0x1b0   :  { %v940_v24 = vrot.slane %v859_v15, %v3452_v28  ;;  %v907_v8 = vmul.f32 %v3251_v44, %v900_v11  ;;  %v908_v41 = vmul.f32 %v3269_v59, %v900_v11  ;;  %v3755_v49 = vadd.f32 %v3697_v0, %v757_v31 }
 0x1b1   :  { %v872_v20 = vmax.f32 %v3737_v58, 0.0  ;;  %v862_v53 = vmax.f32 %v844_v4, 0.0  ;;  %v960_v62 = vrot.slane %v860_v19, %v3452_v28  ;;  %v927_v42 = vmul.f32 %v3257_v63, %v920_v14 }
 0x1b2   :  { %v911_v37 = vadd.f32 %v907_v8, %v891_v43  ;;  %v912_v56 = vadd.f32 %v908_v41, %v892_v1  ;;  %v928_v3 = vmul.f32 %v3281_v5, %v920_v14  ;;  %v863_v44 = vmax.f32 %v845_v52, 0.0 }
 0x1b3   :  { %v947_v59 = vmul.f32 %v3275_v10, %v940_v24  ;;  %v948_v31 = vmul.f32 %v3292_v17, %v940_v24  ;;  %v980_v51 = vrot.slane %v861_v55, %v3452_v28  ;;  %v702_v19 = vcombine.high %v694_v46, %v694_v46 }
 0x1b4   :  { %v931_v38 = vadd.f32 %v927_v42, %v911_v37  ;;  %v932_v29 = vadd.f32 %v928_v3, %v912_v56  ;;  %v703_v15 = vcombine.high %v701_v12, %v701_v12  ;;  %v967_v4 = vmul.f32 %v3287_v54, %v960_v62 }
 0x1b5   :  { %v4301_v63 = vunpack.i.l.bf16 %v3536_v18  ;;  %v710_v5 = vrot.slane %v694_v46, %v3637_v35  ;;  %v717_v11 = vrot.slane %v701_v12, %v3637_v35  ;;  %v724_v17 = vrot.slane %v702_v19, %v3637_v35 }
 0x1b6   :  { %v951_v10 = vadd.f32 %v947_v59, %v931_v38  ;;  %v952_v52 = vadd.f32 %v948_v31, %v932_v29  ;;  %v731_v55 = vrot.slane %v703_v15, %v3637_v35  ;;  %v4302_v14 = vunpack.i.l.bf16 %v3521_v6 }
 0x1b7   :  { %v968_v40 = vmul.f32 %v4301_v63, %v960_v62  ;;  %v732_v43 = vcombine.high %v710_v5, %v710_v5  ;;  %v733_v1 = vcombine.high %v717_v11, %v717_v11  ;;  %v850_v54 = vadd.f32 %v3718_v2, %v717_v11 }
 0x1b8   :  { %v987_v24 = vmul.f32 %v4302_v14, %v980_v51  ;;  %v971_v8 = vadd.f32 %v967_v4, %v951_v10  ;;  %v1000_v41 = vrot.slane %v862_v53, %v3452_v28  ;;  %v734_v62 = vcombine.high %v724_v17, %v724_v17 }
 0x1b9   :  { %v735_v46 = vcombine.high %v731_v55, %v731_v55  ;;  %v972_v37 = vadd.f32 %v968_v40, %v952_v52  ;;  %v847_v12 = vadd.f32 %v3697_v0, %v724_v17  ;;  %v848_v56 = vadd.f32 %v3700_v48, %v732_v43 }
 0x1ba   :  { %v851_v42 = vadd.f32 %v3707_v30, %v731_v55  ;;  %v4303_v3 = vunpack.i.l.bf16 %v3572_v33  ;;  %v846_v31 = vadd.f32 %v3697_v0, %v710_v5  ;;  %v849_v38 = vadd.f32 %v3714_v39, %v734_v62 }
 0x1bb   :  { %v852_v2 = vadd.f32 %v3704_v16, %v733_v1  ;;  %v1020_v53 = vrot.slane %v863_v44, %v3452_v28  ;;  %v865_v29 = vmax.f32 %v847_v12, 0.0  ;;  %v866_v19 = vmax.f32 %v848_v56, 0.0 }
 0x1bc   :  { %v988_v59 = vmul.f32 %v4303_v3, %v980_v51  ;;  %v868_v15 = vmax.f32 %v850_v54, 0.0  ;;  %v4304_v4 = vunpack.i.l.bf16 %v3550_v45  ;;  %v853_v48 = vadd.f32 %v3726_v60, %v735_v46 }
 0x1bd   :  { %v867_v30 = vmax.f32 %v849_v38, 0.0  ;;  %v869_v40 = vmax.f32 %v851_v42, 0.0  ;;  %v991_v11 = vadd.f32 %v987_v24, %v971_v8  ;;  %v888_v0 = vrot.slane %v865_v29, %v3452_v28 }
 0x1be   :  { %v1007_v63 = vmul.f32 %v4304_v4, %v1000_v41  ;;  %v992_v51 = vadd.f32 %v988_v59, %v972_v37  ;;  %v904_v39 = vrot.slane %v866_v19, %v3452_v28  ;;  %v864_v5 = vmax.f32 %v846_v31, 0.0 }
 0x1bf   :  { %v870_v16 = vmax.f32 %v852_v2, 0.0  ;;  %v924_v44 = vrot.slane %v867_v30, %v3452_v28  ;;  %v944_v10 = vrot.slane %v868_v15, %v3452_v28  ;;  %v4305_v52 = vunpack.i.h.bf16 %v3440_v22 }
 0x1c0   :  { %v4306_v55 = vunpack.i.h.bf16 %v3442_v23  ;;  %v4307_v14 = vunpack.i.h.bf16 %v3447_v26  ;;  %v4308_v43 = vunpack.i.h.bf16 %v3449_v27  ;;  %v871_v54 = vmax.f32 %v853_v48, 0.0 }
 0x1c1   :  { %v893_v17 = vmul.f32 %v4305_v52, %v888_v0  ;;  %v4309_v8 = vunpack.i.h.bf16 %v3438_v21  ;;  %v4310_v46 = vunpack.i.h.bf16 %v3465_v32  ;;  %v964_v12 = vrot.slane %v869_v40, %v3452_v28 }
 0x1c2   :  { %v894_v60 = vmul.f32 %v4306_v55, %v888_v0  ;;  %v909_v24 = vmul.f32 %v4307_v14, %v904_v39  ;;  %v910_v1 = vmul.f32 %v4308_v43, %v904_v39  ;;  %v4311_v22 = vunpack.i.l.bf16 %v3605_v50 }
 0x1c3   :  { %v929_v62 = vmul.f32 %v4309_v8, %v924_v44  ;;  %v930_v37 = vmul.f32 %v4310_v46, %v924_v44  ;;  %v1011_v3 = vadd.f32 %v1007_v63, %v991_v11  ;;  %v873_v26 = vmax.f32 %v3755_v49, 0.0 }
 0x1c4   :  { %v1008_v56 = vmul.f32 %v4311_v22, %v1000_v41  ;;  %v913_v23 = vadd.f32 %v909_v24, %v893_v17  ;;  %v914_v42 = vadd.f32 %v910_v1, %v894_v60  ;;  %v4312_v27 = vunpack.i.h.bf16 %v3472_v36 }
 0x1c5   :  { %v4313_v31 = vunpack.i.h.bf16 %v3501_v57  ;;  %v984_v38 = vrot.slane %v870_v16, %v3452_v28  ;;  %v4314_v19 = vunpack.i.l.bf16 %v3560_v7  ;;  %v4315_v41 = vunpack.i.h.bf16 %v3484_v47 }
 0x1c6   :  { %v949_v59 = vmul.f32 %v4312_v27, %v944_v10  ;;  %v933_v32 = vadd.f32 %v929_v62, %v913_v23  ;;  %v934_v2 = vadd.f32 %v930_v37, %v914_v42  ;;  %v1012_v29 = vadd.f32 %v1008_v56, %v992_v51 }
 0x1c7   :  { %v950_v21 = vmul.f32 %v4313_v31, %v944_v10  ;;  %v1027_v15 = vmul.f32 %v4314_v19, %v1020_v53  ;;  %v969_v4 = vmul.f32 %v4315_v41, %v964_v12  ;;  %v1004_v63 = vrot.slane %v871_v54, %v3452_v28 }
 0x1c8   :  { %v4316_v49 = vunpack.i.l.bf16 %v3578_v13  ;;  %v1040_v48 = vrot.slane %v864_v5, %v3452_v28  ;;  %v953_v57 = vadd.f32 %v949_v59, %v933_v32  ;;  %v4317_v40 = vunpack.i.h.bf16 %v3536_v18 }
 0x1c9   :  { %v954_v30 = vadd.f32 %v950_v21, %v934_v2  ;;  %v1031_v0 = vadd.f32 %v1027_v15, %v1011_v3  ;;  %v1024_v51 = vrot.slane %v872_v20, %v3452_v28  ;;  %v4318_v47 = vunpack.i.l.bf16 %v3626_v9 }
 0x1ca   :  { %v1028_v36 = vmul.f32 %v4316_v49, %v1020_v53  ;;  %v970_v11 = vmul.f32 %v4317_v40, %v964_v12  ;;  %v1048_v44 = vmul.f32 %v1040_v48, %v3643_v34  ;;  %v973_v10 = vadd.f32 %v969_v4, %v953_v57 }
 0x1cb   :  { %v1047_v16 = vmul.f32 %v4318_v47, %v1040_v48  ;;  %v4319_v5 = vunpack.i.h.bf16 %v3521_v6  ;;  %v4320_v17 = vunpack.i.h.bf16 %v3572_v33  ;;  %v1044_v55 = vrot.slane %v873_v26, %v3452_v28 }
 0x1cc   :  { %v1032_v39 = vadd.f32 %v1028_v36, %v1012_v29  ;;  %v974_v53 = vadd.f32 %v970_v11, %v954_v30  ;;  %v4321_v24 = vunpack.i.h.bf16 %v3550_v45  ;;  %v4322_v1 = vunpack.i.h.bf16 %v3605_v50 }
 0x1cd   :  { %v989_v52 = vmul.f32 %v4319_v5, %v984_v38  ;;  %v990_v18 = vmul.f32 %v4320_v17, %v984_v38  ;;  %v1051_v60 = vadd.f32 %v1047_v16, %v1031_v0  ;;  %v4323_v6 = vunpack.i.h.bf16 %v3560_v7 }
 0x1ce   :  { %v1052_v14 = vadd.f32 %v1048_v44, %v1032_v39  ;;  %v1009_v43 = vmul.f32 %v4321_v24, %v1004_v63  ;;  %v1010_v34 = vmul.f32 %v4322_v1, %v1004_v63  ;;  %v4324_v33 = vunpack.i.h.bf16 %v3578_v13 }
 0x1cf   :  { %v993_v58 = vadd.f32 %v989_v52, %v973_v10  ;;  %v994_v20 = vadd.f32 %v990_v18, %v974_v53  ;;  %v1059_v54 = vcombine.high %v1051_v60, %v1051_v60  ;;  %v1066_v8 = vrot.slane %v1051_v60, %v3637_v35 }
 0x1d0   :  { %v1029_v62 = vmul.f32 %v4323_v6, %v1024_v51  ;;  %v1030_v46 = vmul.f32 %v4324_v33, %v1024_v51  ;;  %v4325_v45 = vunpack.i.h.bf16 %v3626_v9  ;;  %v1050_v50 = vmul.f32 %v1044_v55, %v3615_v61 }
 0x1d1   :  { %v1013_v37 = vadd.f32 %v1009_v43, %v993_v58  ;;  %v1014_v12 = vadd.f32 %v1010_v34, %v994_v20  ;;  %v1073_v22 = vrot.slane %v1059_v54, %v3637_v35  ;;  %v1074_v56 = vcombine.high %v1066_v8, %v1066_v8 }
 0x1d2   :  { %v1049_v23 = vmul.f32 %v4325_v45, %v1044_v55  ;;  %v1082_v13 = vrot.slane %v1066_v8, %v3637_v35  ;;  %v1114_v21 = vrot.slane %v1052_v14, %v3637_v35  ;;  %v1604_v45 = vld [vmem:[%s4272_s5 + $0x28] sm:$0xff] }
 0x1d3   :  { %v1033_v42 = vadd.f32 %v1029_v62, %v1013_v37  ;;  %v1034_v3 = vadd.f32 %v1030_v46, %v1014_v12  ;;  %v1075_v26 = vcombine.high %v1073_v22, %v1073_v22  ;;  %v1096_v27 = vrot.slane %v1074_v56, %v3637_v35  ;;  %v1603_v56 = vld [vmem:[%s4272_s5 + $0x20] sm:$0xff] }
 0x1d4   :  { %v1089_v31 = vrot.slane %v1073_v22, %v3637_v35  ;;  %v1121_v63 = vrot.slane %v1114_v21, %v3637_v35 }
 0x1d5   :  { %v1053_v7 = vadd.f32 %v1049_v23, %v1033_v42  ;;  %v1054_v59 = vadd.f32 %v1050_v50, %v1034_v3  ;;  %v1103_v38 = vrot.slane %v1075_v26, %v3637_v35  ;;  %v1185_v2 = vcombine.low %v1082_v13, %v1096_v27  ;;  %v3890_v3 = vld [vmem:[%s4269_s2] sm:$0xff] }
 0x1d6   :  { %v3099_v61 = vcombine.high %v1082_v13, %v1096_v27  ;;  %v3203_v23 = vpack.c.bf16 %v1604_v45, %v1603_v56  ;;  %v3378_v50 = vmov 0.0|0.0   ;;  %v3380_v42 = vmov 0.0   ;;  %v3896_v27 = vld [vmem:[%s4269_s2 + $0x8] sm:$0xff] }
 0x1d7   :  { %v1122_v32 = vcombine.high %v1053_v7, %v1053_v7  ;;  %v1129_v9 = vrot.slane %v1053_v7, %v3637_v35  ;;  %v1187_v29 = vcombine.low %v1089_v31, %v1103_v38  ;;  %v3100_v19 = vcombine.high %v1089_v31, %v1103_v38  ;;  %3202 = vmatprep.subr.bf16.mxu0 %v3378_v50  ;;  %v878_v7 = vld [vmem:[%s4271_s4 + $0x20] sm:$0xff] }
 0x1d8   :  { %v1177_v48 = vrot.slane %v1054_v59, %v3637_v35  ;;  %v1195_v0 = vrot.slane %v1185_v2, %v3637_v35  ;;  %v1202_v51 = vrot.slane %v3099_v61, %v3637_v35  ;;  %3204 = vmatpush3.bf16.msra.mxu0 %v3203_v23  ;;  %3160 = vmatprep.mubr.msk.f32.mxu0 %vm3379_vm2, %v3380_v42  ;;  %v3381_v26 = vmov 18   ;;  %v3952_v23 = vld [vmem:[%s4272_s5 + $0x10] sm:$0xff] }
 0x1d9   :  { %v1136_v15 = vrot.slane %v1122_v32, %v3637_v35  ;;  %v1137_v41 = vcombine.high %v1129_v9, %v1129_v9  ;;  %v1145_v4 = vrot.slane %v1129_v9, %v3637_v35  ;;  %v1209_v49 = vrot.slane %v1187_v29, %v3637_v35  ;;  %3205 = vmatprep.subr.bf16.mxu0 %v3378_v50  ;;  %v3957_v50 = vld [vmem:[%s4272_s5 + $0x18] sm:$0xff] }
 0x1da   :  { %v1216_v36 = vrot.slane %v3100_v19, %v3637_v35  ;;  %v1184_v52 = vrot.slane %v1177_v48, %v3637_v35  ;;  %v1217_v14 = vcombine.low %v1195_v0, %v1202_v51  ;;  %3342 = vset.pattern.permute.xlu1 %v3381_v26  ;;  %3343 = vset.pattern.permute.xlu0 %v3381_v26 }
 0x1db   :  { %v1138_v57 = vcombine.high %v1136_v15, %v1136_v15  ;;  %v1152_v30 = vrot.slane %v1136_v15, %v3637_v35  ;;  %v1159_v40 = vrot.slane %v1137_v41, %v3637_v35  ;;  %v1167_v11 = vcombine.high %v1145_v4, %v1145_v4  ;;  %2363 = vperm.xlu1 %3342, %v3890_v3  }
 0x1dc   :  { %v1234_v39 = vcombine.low %v1121_v63, %v1145_v4  ;;  %v1218_v53 = vcombine.low %v1209_v49, %v1216_v36  ;;  %v1225_v8 = vrot.slane %v1217_v14, %v3637_v35  ;;  %v1504_v59 = vrot.slane %v878_v7, %v3452_v28 }
 0x1dd   :  { %v1166_v47 = vrot.slane %v1138_v57, %v3637_v35  ;;  %v1168_v16 = vcombine.high %v1152_v30, %v1152_v30  ;;  %v1169_v44 = vcombine.high %v1159_v40, %v1159_v40  ;;  %v1235_v10 = vcombine.low %v1159_v40, %v1167_v11 }
 0x1de   :  { %v1244_v5 = vrot.slane %v1234_v39, %v3637_v35  ;;  %v1232_v1 = vrot.slane %v1218_v53, %v3637_v35  ;;  %v1506_v13 = vcombine.high %v1504_v59, %v1504_v59  ;;  %v1513_v21 = vrot.slane %v1504_v59, %v3637_v35 }
 0x1df   :  { %v1236_v17 = vcombine.low %v1169_v44, %v1152_v30  ;;  %v1237_v18 = vcombine.low %v1166_v47, %v1168_v16  ;;  %v1251_v55 = vrot.slane %v1235_v10, %v3637_v35  ;;  %v1170_v60 = vcombine.high %v1166_v47, %v1166_v47  ;;  %2368 = vperm.xlu1 %3342, %v3896_v27  }
 0x1e0   :  { %v1233_v46 = vcombine.low %v1225_v8, %v1232_v1  ;;  %v1520_v31 = vrot.slane %v1506_v13, %v3637_v35  ;;  %v1521_v32 = vcombine.high %v1513_v21, %v1513_v21  ;;  %v3910_v29 = vrot.slane %v1513_v21, %v3637_v35 }
 0x1e1   :  { %v1258_v58 = vrot.slane %v1236_v17, %v3637_v35  ;;  %v1265_v20 = vrot.slane %v1237_v18, %v3637_v35  ;;  %v1266_v24 = vcombine.low %v1244_v5, %v1251_v55  ;;  %v1283_v43 = vcombine.low %v1170_v60, %v1184_v52 }
 0x1e2   :  { %v1522_v38 = vcombine.high %v1520_v31, %v1520_v31  ;;  %v3913_v15 = vrot.slane %v1520_v31, %v3637_v35  ;;  %v3916_v41 = vrot.slane %v1521_v32, %v3637_v35  ;;  %v3927_v39 = vcombine.high %v3910_v29, %v3910_v29 }
 0x1e3   :  { %v1267_v34 = vcombine.low %v1258_v58, %v1265_v20  ;;  %v1290_v54 = vrot.slane %v1283_v43, %v3637_v35  ;;  %v1274_v6 = vrot.slane %v1266_v24, %v3637_v35 }
 0x1e4   :  { %v3906_v9 = vrot.slane %v1522_v38, %v3637_v35  ;;  %v3931_v47 = vcombine.high %v3913_v15, %v3913_v15  ;;  %v1553_v16 = vcombine.high %v3916_v41, %v3916_v41 }
 0x1e5   :  { %v1281_v62 = vrot.slane %v1267_v34, %v3637_v35  ;;  %v1297_v33 = vrot.slane %v1290_v54, %v3637_v35 }
 0x1e6   :  { %v1554_v57 = vcombine.high %v3906_v9, %v3906_v9 }
 0x1e7   :  { %v1282_v37 = vcombine.low %v1274_v6, %v1281_v62  ;;  %v1302_v22 = vpack.c.bf16 %v1297_v33, %v1297_v33 }
 0x1e9   :  { %v1301_v12 = vpack.c.bf16 %v1282_v37, %v1233_v46 }
 0x1eb   :  { %3152 = vmatprep.mubr.msk.bf16.mxu1 %vm1305_vm1, %v1301_v12 }
 0x1ec   :  { %3153 = vmatmul.mubr.msk.bf16.vlgmr.msra.gmra.mrb[4].mxu1 %vm1305_vm1, %v1302_v22 }
 0x2bf   :  { %v3154_v2 = vpop.f32.mrb[4].mxu1 }
 0x2c0   :  { %v1467_v61 = vrot.slane %v3154_v2, %v3637_v35  ;;  %v1346_v19 = vpop.f32.mrb[5].mxu1 }
 0x2c1   :  { %v1363_v4 = vcombine.high %v1346_v19, %v1346_v19  ;;  %v1370_v63 = vrot.slane %v1346_v19, %v3637_v35  ;;  %v3155_v49 = vpop.f32.mrb[6].mxu1 }
 0x2c2   :  { %v1468_v36 = vcombine.high %v1467_v61, %v1467_v61  ;;  %v1475_v48 = vrot.slane %v1467_v61, %v3637_v35  ;;  %v1349_v30 = vpop.f32.mrb[7].mxu1  ;;  %v3206_v61 = vpack.c.bf16 %v3957_v50, %v3952_v23 }
 0x2c3   :  { %v1377_v40 = vrot.slane %v1363_v4, %v3637_v35  ;;  %v1378_v11 = vcombine.high %v1370_v63, %v1370_v63  ;;  %v1386_v0 = vrot.slane %v1370_v63, %v3637_v35  ;;  %v1412_v18 = vcombine.high %v1349_v30, %v1349_v30 }
 0x2c4   :  { %v1482_v51 = vrot.slane %v1468_v36, %v3637_v35  ;;  %v3937_v52 = vadd.f32 %v1554_v57, %v1475_v48  ;;  %v1419_v1 = vrot.slane %v1349_v30, %v3637_v35 }
 0x2c5   :  { %v1379_v44 = vcombine.high %v1377_v40, %v1377_v40  ;;  %v1393_v10 = vrot.slane %v1377_v40, %v3637_v35  ;;  %v1400_v53 = vrot.slane %v1378_v11, %v3637_v35  ;;  %v1408_v5 = vcombine.high %v1386_v0, %v1386_v0 }
 0x2c6   :  { %v1563_v17 = vadd.f32 %v3910_v29, %v1386_v0  ;;  %v1580_v20 = vadd.f32 %v3910_v29, %v1482_v51  ;;  %v1426_v37 = vrot.slane %v1412_v18, %v3637_v35  ;;  %v1427_v21 = vcombine.high %v1419_v1, %v1419_v1 }
 0x2c7   :  { %v1407_v55 = vrot.slane %v1379_v44, %v3637_v35  ;;  %v1409_v60 = vcombine.high %v1393_v10, %v1393_v10  ;;  %v1410_v14 = vcombine.high %v1400_v53, %v1400_v53  ;;  %v1564_v58 = vadd.f32 %v3916_v41, %v1400_v53 }
 0x2c8   :  { %v1565_v24 = vadd.f32 %v3927_v39, %v1408_v5  ;;  %v1567_v43 = vadd.f32 %v3913_v15, %v1393_v10  ;;  %v1581_v62 = vmax.f32 %v1563_v17, 0.0  ;;  %v1597_v38 = vmax.f32 %v3937_v52, 0.0 }
 0x2c9   :  { %v1411_v34 = vcombine.high %v1407_v55, %v1407_v55  ;;  %v1566_v54 = vadd.f32 %v1553_v16, %v1410_v14  ;;  %v1568_v8 = vadd.f32 %v3906_v9, %v1407_v55  ;;  %v1569_v6 = vadd.f32 %v3931_v47, %v1409_v60 }
 0x2ca   :  { %v1582_v33 = vmax.f32 %v1564_v58, 0.0  ;;  %v1583_v46 = vmax.f32 %v1565_v24, 0.0  ;;  %v1585_v56 = vmax.f32 %v1567_v43, 0.0  ;;  %v3960_v32 = vmax.f32 %v1580_v20, 0.0 }
 0x2cb   :  { %v1570_v12 = vadd.f32 %v1554_v57, %v1411_v34  ;;  %v1584_v22 = vmax.f32 %v1566_v54, 0.0  ;;  %v1586_v45 = vmax.f32 %v1568_v8, 0.0  ;;  %v1587_v26 = vmax.f32 %v1569_v6, 0.0 }
 0x2cc   :  { %v1625_v7 = vcombine.low %v1581_v62, %v1582_v33  ;;  %v1428_v2 = vcombine.high %v1426_v37, %v1426_v37  ;;  %v1435_v49 = vrot.slane %v1419_v1, %v3637_v35  ;;  %v1442_v48 = vrot.slane %v1426_v37, %v3637_v35 }
 0x2cd   :  { %v1588_v59 = vmax.f32 %v1570_v12, 0.0  ;;  %v1626_v13 = vcombine.low %v1583_v46, %v1584_v22  ;;  %v1627_v31 = vcombine.low %v1585_v56, %v1586_v45  ;;  %v1449_v57 = vrot.slane %v1427_v21, %v3637_v35 }
 0x2ce   :  { %v1635_v4 = vrot.slane %v1625_v7, %v3637_v35  ;;  %v1456_v30 = vrot.slane %v1428_v2, %v3637_v35  ;;  %v1457_v0 = vcombine.high %v1435_v49, %v1435_v49  ;;  %v1571_v51 = vadd.f32 %v3910_v29, %v1435_v49 }
 0x2cf   :  { %v1628_v19 = vcombine.low %v1587_v26, %v1588_v59  ;;  %v1642_v63 = vrot.slane %v1626_v13, %v3637_v35  ;;  %v1649_v36 = vrot.slane %v1627_v31, %v3637_v35  ;;  %v1458_v44 = vcombine.high %v1442_v48, %v1442_v48 }
 0x2d0   :  { %v1459_v10 = vcombine.high %v1449_v57, %v1449_v57  ;;  %v1460_v53 = vcombine.high %v1456_v30, %v1456_v30  ;;  %v1572_v5 = vadd.f32 %v3910_v29, %v1449_v57  ;;  %v1573_v55 = vadd.f32 %v3916_v41, %v1457_v0 }
 0x2d1   :  { %v1656_v40 = vrot.slane %v1628_v19, %v3637_v35  ;;  %v1657_v11 = vcombine.low %v1635_v4, %v1642_v63  ;;  %v1575_v60 = vadd.f32 %v1553_v16, %v1442_v48  ;;  %v1576_v58 = vadd.f32 %v3913_v15, %v1456_v30  ;;  %v1599_v19 = vld [vmem:[%s4272_s5] sm:$0xff]  ;;  %v1600_v4 = vld [vmem:[%s4272_s5 + $0x8] sm:$0xff] }
 0x2d2   :  { %v1574_v14 = vadd.f32 %v3927_v39, %v1459_v10  ;;  %v1577_v20 = vadd.f32 %v3906_v9, %v1458_v44  ;;  %v1578_v24 = vadd.f32 %v3931_v47, %v1460_v53  ;;  %v1589_v1 = vmax.f32 %v1571_v51, 0.0 }
 0x2d3   :  { %v1658_v17 = vcombine.low %v1649_v36, %v1656_v40  ;;  %v1665_v18 = vrot.slane %v1657_v11, %v3637_v35  ;;  %v1590_v34 = vmax.f32 %v1572_v5, 0.0  ;;  %v1591_v54 = vmax.f32 %v1573_v55, 0.0 }
 0x2d4   :  { %v1592_v29 = vmax.f32 %v1574_v14, 0.0  ;;  %v1593_v8 = vmax.f32 %v1575_v60, 0.0  ;;  %v1594_v6 = vmax.f32 %v1576_v58, 0.0  ;;  %v1595_v62 = vmax.f32 %v1577_v20, 0.0 }
 0x2d5   :  { %v1672_v43 = vrot.slane %v1658_v17, %v3637_v35  ;;  %v1596_v41 = vmax.f32 %v1578_v24, 0.0  ;;  %v1680_v39 = vrot.slane %v1589_v1, %v3637_v35  ;;  %v1688_v16 = vcombine.low %v1590_v34, %v1591_v54 }
 0x2d6   :  { %v1689_v15 = vcombine.low %v1592_v29, %v1593_v8  ;;  %v1690_v46 = vcombine.low %v1594_v6, %v1595_v62  ;;  %v1776_v9 = vcombine.low %v1589_v1, %v3960_v32  ;;  %v1944_v47 = vcombine.low %v1589_v1, %v1590_v34 }
 0x2d7   :  { %v3981_v33 = vcombine.low %v1665_v18, %v1672_v43  ;;  %v1743_v37 = vrot.slane %v3960_v32, %v3637_v35  ;;  %v1687_v12 = vrot.slane %v1680_v39, %v3637_v35  ;;  %v1691_v22 = vcombine.low %v1596_v41, %v1597_v38 }
 0x2d8   :  { %v1698_v45 = vrot.slane %v1688_v16, %v3637_v35  ;;  %v1705_v26 = vrot.slane %v1689_v15, %v3637_v35  ;;  %v1945_v7 = vcombine.low %v1591_v54, %v1592_v29  ;;  %v1946_v59 = vcombine.low %v1593_v8, %v1594_v6  ;;  %v2525_v15 = vld [vmem:[%s4273_s6] sm:$0xff] }
 0x2d9   :  { %v1755_v56 = vsel %vm580_vm0, %v3981_v33, 0.0  ;;  %v1712_v13 = vrot.slane %v1690_v46, %v3637_v35  ;;  %v1719_v31 = vrot.slane %v1691_v22, %v3637_v35  ;;  %v1757_v21 = vsel %vm1756_vm3, %v1687_v12, 0.0  ;;  %v2528_v12 = vld [vmem:[%s4273_s6 + $0x18] sm:$0xff]  ;;  %v2529_v22 = vld [vmem:[%s4273_s6 + $0x20] sm:$0xff] }
 0x2da   :  { %v1947_v2 = vcombine.low %v1595_v62, %v1596_v41  ;;  %v1720_v63 = vcombine.low %v1698_v45, %v1705_v26  ;;  %v1758_v49 = vadd.f32 %v1757_v21, %v1755_v56  ;;  %v1954_v36 = vrot.slane %v1944_v47, %v3637_v35  ;;  %v2530_v45 = vld [vmem:[%s4273_s6 + $0x28] sm:$0xff]  ;;  %v2532_v26 = vld [vmem:[%s4273_s6 + $0x38] sm:$0xff] }
 0x2db   :  { %v1961_v48 = vrot.slane %v1945_v7, %v3637_v35  ;;  %v1721_v57 = vcombine.low %v1712_v13, %v1719_v31  ;;  %v1968_v30 = vrot.slane %v1946_v59, %v3637_v35  ;;  %v1783_v11 = vrot.slane %v1776_v9, %v3637_v35  ;;  %v2533_v7 = vld [vmem:[%s4273_s6 + $0x40] sm:$0xff]  ;;  %v2534_v13 = vld [vmem:[%s4273_s6 + $0x48] sm:$0xff] }
 0x2dc   :  { %v1975_v40 = vrot.slane %v1947_v2, %v3637_v35  ;;  %v1750_v0 = vrot.slane %v1743_v37, %v3637_v35  ;;  %v2012_v51 = vpack.c.bf16 %v1600_v4, %v1599_v19  ;;  %v1759_v44 = vrot.slane %v1758_v49, 4  ;;  %v2527_v37 = vld [vmem:[%s4273_s6 + $0x10] sm:$0xff]  ;;  %v1606_v2 = vld [vmem:[%s4272_s5 + $0x38] sm:$0xff] }
 0x2dd   :  { %v1976_v10 = vcombine.low %v1954_v36, %v1961_v48  ;;  %v1728_v53 = vrot.slane %v1720_v63, %v3637_v35  ;;  %v1735_v5 = vrot.slane %v1721_v57, %v3637_v35  ;;  %v1790_v17 = vrot.slane %v1783_v11, %v3637_v35 }
 0x2de   :  { %v1977_v18 = vcombine.low %v1968_v30, %v1975_v40  ;;  %v1760_v55 = vadd.f32 %v1759_v44, %v1758_v49  ;;  %v1766_v24 = vsel %vm1756_vm3, %v1750_v0, 0.0  ;;  %v1993_v23 = vcombine.low %v1597_v38, %v3960_v32 }
 0x2df   :  { %v1736_v60 = vcombine.low %v1728_v53, %v1735_v5  ;;  %3161 = vmatmul.mubr.msk.f32.vlgmr.msra.gmra.mrb[0].mxu0 %vm580_vm0, %v1790_v17  ;;  %v1984_v14 = vrot.slane %v1976_v10, %v3637_v35  ;;  %v3212_v56 = vpack.c.bf16 %v2529_v22, %v2528_v12  ;;  %v3220_v59 = vpack.c.bf16 %v2533_v7, %v2532_v26 }
 0x2e0   :  { %v1991_v58 = vrot.slane %v1977_v18, %v3637_v35  ;;  %3207 = vmatpush3.bf16.msra.mxu0 %v3206_v61  ;;  %3167 = vmatprep.mubr.msk.f32.mxu0 %vm3379_vm2, %v3380_v42  ;;  %v1761_v20 = vrot.slane %v1760_v55, 2  ;;  %v2000_v39 = vrot.slane %v1993_v23, %v3637_v35  ;;  %v1942_v19 = vrot.slane %v1606_v2, %v3452_v28 }
 0x2e1   :  { %3170 = vmatprep.subr.bf16.mxu0 %v2012_v51  ;;  %v1765_v43 = vsel %vm580_vm0, %v1736_v60, 0.0  ;;  %3213 = vmatprep.subr.bf16.mxu1 %v3212_v56 }
 0x2e2   :  { %v1992_v1 = vcombine.low %v1984_v14, %v1991_v58  ;;  %v1767_v34 = vadd.f32 %v1766_v24, %v1765_v43  ;;  %v1762_v29 = vadd.f32 %v1761_v20, %v1760_v55  ;;  %v2007_v52 = vrot.slane %v2000_v39, %v3637_v35  ;;  %3215 = vmatpush3.bf16.msra.mxu1 %v3212_v56 }
 0x2e4   :  { %v2010_v54 = vpack.c.bf16 %v1992_v1, %v3981_v33  ;;  %v1768_v8 = vrot.slane %v1767_v34, 4  ;;  %v1763_v62 = vrot.slane %v1762_v29, 1  ;;  %v2526_v33 = vld [vmem:[%s4273_s6 + $0x8] sm:$0xff]  ;;  %v2011_v47 = vpack.c.bf16 %v2007_v52, %v2007_v52 }
 0x2e5   :  { %v3208_v38 = vpack.c.bf16 %v2526_v33, %v2525_v15 }
 0x2e6   :  { %v1769_v6 = vadd.f32 %v1768_v8, %v1767_v34  ;;  %v1764_v50 = vadd.f32 %v1763_v62, %v1762_v29 }
 0x2e8   :  { %v1770_v41 = vrot.slane %v1769_v6, 2  ;;  %v1774_v46 = vmul.f32 0.11111111, %v1764_v50 }
 0x2ea   :  { %v1771_v42 = vadd.f32 %v1770_v41, %v1769_v6 }
 0x2ec   :  { %v1772_v61 = vrot.slane %v1771_v42, 1 }
 0x2ee   :  { %v1773_v16 = vadd.f32 %v1772_v61, %v1771_v42 }
 0x2f0   :  { %v1775_v9 = vmul.f32 0.11111111, %v1773_v16 }
 0x2f2   :  { %v1866_v32 = vsel %vm1865_vm4, %v1775_v9, %v1774_v46 }
 0x2f3   :  { %3168 = vmatmul.mubr.msk.f32.vlgmr.msra.gmra.mrb[2].mxu0 %vm580_vm0, %v1866_v32 }
 0x2f4   :  { %3171 = vmatpush3.bf16.msra.mxu0 %v2012_v51  ;;  %3172 = vmatprep.mubr.msk.bf16.mxu0 %vm580_vm0, %v2010_v54 }
 0x2f5   :  { %3209 = vmatprep.subr.bf16.mxu0 %v3208_v38 }
 0x2f7   :  { %3173 = vmatmul.mubr.msk.bf16.vlgmr.msra.gmra.mrb[4].mxu0 %vm580_vm0, %v2011_v47 }
 0x2f8   :  { %3211 = vmatpush3.bf16.msra.mxu0 %v3208_v38  ;;  %3182 = vmatprep.mubr.msk.f32.mxu0 %vm2544_vm5, %v3890_v3  ;;  %v2531_v3 = vld [vmem:[%s4273_s6 + $0x30] sm:$0xff] }
 0x2f9   :  { %3180 = vmatprep.subr.mxu0 %v2527_v37 }
 0x2fc   :  { %3181 = vmatpush3.msra.mxu0 %v2527_v37 }
 0x2ff   :  { %3183 = vmatmul.mubr.msk.f32.vlgmr.msra.gmra.mrb[8].mxu0 %vm2544_vm5, %v3896_v27  ;;  %v3216_v27 = vpack.c.bf16 %v2531_v3, %v2530_v45 }
 0x301   :  { %3217 = vmatprep.subr.bf16.mxu1 %v3216_v27 }
 0x302   :  { %3219 = vmatpush3.bf16.msra.mxu1 %v3216_v27 }
 0x303   :  { %3221 = vmatprep.subr.bf16.mxu1 %v3220_v59 }
 0x306   :  { %3223 = vmatpush3.bf16.msra.mxu1 %v3220_v59 }
 0x307   :  { %3197 = vmatprep.subr.msk.mxu1 %vm2637_vm6, %v2534_v13 }
 0x30a   :  { %3198 = vmatpush3.msk.msra.mxu1 %vm2637_vm6, %v2534_v13 }
 0x3b2   :  { %v1859_v31 = vpop.f32.mrb[0].mxu0 }
 0x3b3   :  { %v3162_v21 = vpop.f32.mrb[1].mxu0 }
 0x3c6   :  { %v1935_v4 = vpop.f32.mrb[2].mxu0 }
 0x3c7   :  { %v1936_v63 = vadd.f32 %v1935_v4, %v1859_v31  ;;  %v3169_v49 = vpop.f32.mrb[3].mxu0 }
 0x3c9   :  { %v1943_v36 = vadd.f32 %v1942_v19, %v1936_v63 }
 0x3ca   :  { %v3174_v48 = vpop.f32.mrb[4].mxu0 }
 0x3cb   :  { %v2207_v57 = vrot.slane %v1943_v36, %v3637_v35  ;;  %v2053_v30 = vpop.f32.mrb[5].mxu0  ;;  %v2174_v10 = vrot.slane %v3174_v48, %v3637_v35 }
 0x3cc   :  { %v2070_v40 = vcombine.high %v2053_v30, %v2053_v30  ;;  %v2077_v11 = vrot.slane %v2053_v30, %v3637_v35  ;;  %v3175_v0 = vpop.f32.mrb[6].mxu0 }
 0x3cd   :  { %v2208_v51 = vcombine.high %v2207_v57, %v2207_v57  ;;  %v2215_v44 = vrot.slane %v2207_v57, %v3637_v35  ;;  %v2056_v53 = vpop.f32.mrb[7].mxu0  ;;  %v2181_v8 = vrot.slane %v2174_v10, %v3637_v35 }
 0x3ce   :  { %v2084_v5 = vrot.slane %v2070_v40, %v3637_v35  ;;  %v2085_v17 = vcombine.high %v2077_v11, %v2077_v11  ;;  %v2093_v18 = vrot.slane %v2077_v11, %v3637_v35  ;;  %v2119_v55 = vcombine.high %v2056_v53, %v2056_v53 }
 0x3cf   :  { %v2222_v60 = vrot.slane %v2208_v51, %v3637_v35  ;;  %v2226_v14 = vrot.slane %v2215_v44, %v3452_v28  ;;  %v2126_v43 = vrot.slane %v2056_v53, %v3637_v35 }
 0x3d0   :  { %v2086_v58 = vcombine.high %v2084_v5, %v2084_v5  ;;  %v2100_v20 = vrot.slane %v2084_v5, %v3637_v35  ;;  %v2107_v24 = vrot.slane %v2085_v17, %v3637_v35  ;;  %v2133_v29 = vrot.slane %v2119_v55, %v3637_v35 }
 0x3d1   :  { %v2230_v1 = vrot.slane %v2222_v60, %v3452_v28  ;;  %v2231_v34 = vcombine.high %v2226_v14, %v2226_v14  ;;  %v2238_v54 = vrot.slane %v2226_v14, %v3637_v35  ;;  %v2115_v62 = vcombine.high %v2093_v18, %v2093_v18 }
 0x3d2   :  { %v2114_v6 = vrot.slane %v2086_v58, %v3637_v35  ;;  %v3184_v41 = vpop.f32.mrb[8].mxu0  ;;  %v2116_v16 = vcombine.high %v2100_v20, %v2100_v20  ;;  %v2117_v15 = vcombine.high %v2107_v24, %v2107_v24  ;;  %v2134_v33 = vcombine.high %v2126_v43, %v2126_v43 }
 0x3d3   :  { %v2280_v23 = vcombine.high %v2230_v1, %v2230_v1  ;;  %v2245_v42 = vrot.slane %v2231_v34, %v3637_v35  ;;  %v2246_v50 = vcombine.high %v2238_v54, %v2238_v54  ;;  %v2254_v61 = vrot.slane %v2238_v54, %v3637_v35  ;;  %v2615_v39 = vpop.f32.mrb[9].mxu0  ;;  %v2535_v34 = vld [vmem:[%s4273_s6 + $0x50] sm:$0xff] }
 0x3d4   :  { %v2135_v46 = vcombine.high %v2133_v29, %v2133_v29  ;;  %v2118_v47 = vcombine.high %v2114_v6, %v2114_v6  ;;  %v2149_v22 = vrot.slane %v2133_v29, %v3637_v35  ;;  %v2142_v63 = vrot.slane %v2126_v43, %v3637_v35 }
 0x3d5   :  { %v2294_v9 = vrot.slane %v2280_v23, %v3637_v35  ;;  %v2247_v52 = vcombine.high %v2245_v42, %v2245_v42  ;;  %v2261_v38 = vrot.slane %v2245_v42, %v3637_v35  ;;  %v2268_v32 = vrot.slane %v2246_v50, %v3637_v35  ;;  %v2539_v23 = vld [vmem:[%s4273_s6 + $0x70] sm:$0xff] }
 0x3d6   :  { %v2276_v37 = vcombine.high %v2254_v61, %v2254_v61  ;;  %v4088_v12 = vadd.f32 %v2254_v61, %v2093_v18  ;;  %v2163_v13 = vrot.slane %v2135_v46, %v3637_v35  ;;  %v2156_v49 = vrot.slane %v2134_v33, %v3637_v35  ;;  %3224 = vpush %v2539_v23  ;;  %v1605_v42 = vld [vmem:[%s4272_s5 + $0x30] sm:$0xff] }
 0x3d7   :  { %v2296_v56 = vcombine.high %v2294_v9, %v2294_v9  ;;  %v2275_v45 = vrot.slane %v2247_v52, %v3637_v35  ;;  %v2277_v3 = vcombine.high %v2261_v38, %v2261_v38  ;;  %v2278_v27 = vcombine.high %v2268_v32, %v2268_v32 }
 0x3d8   :  { %v4092_v26 = vadd.f32 %v2268_v32, %v2107_v24  ;;  %v4094_v7 = vadd.f32 %v2276_v37, %v2115_v62  ;;  %v4096_v59 = vadd.f32 %v2261_v38, %v2100_v20  ;;  %v2165_v36 = vcombine.high %v2149_v22, %v2149_v22 }
 0x3d9   :  { %v2324_v31 = vrot.slane %v2296_v56, %v3637_v35  ;;  %v2279_v21 = vcombine.high %v2275_v45, %v2275_v45  ;;  %v4100_v2 = vadd.f32 %v2278_v27, %v2117_v15  ;;  %v4102_v19 = vadd.f32 %v2275_v45, %v2114_v6 }
 0x3da   :  { %v4104_v4 = vadd.f32 %v2277_v3, %v2116_v16  ;;  %v2287_v30 = vrot.slane %v2230_v1, %v3637_v35  ;;  %v2310_v40 = vrot.slane %v2294_v9, %v3637_v35  ;;  %v2167_v11 = vcombine.high %v2163_v13, %v2163_v13  ;;  %v2538_v16 = vld [vmem:[%s4273_s6 + $0x68] sm:$0xff] }
 0x3db   :  { %v2328_v48 = vcombine.high %v2324_v31, %v2324_v31  ;;  %v4108_v57 = vadd.f32 %v2279_v21, %v2118_v47  ;;  %v4112_v0 = vadd.f32 %v2324_v31, %v2165_v36  ;;  %v2164_v5 = vcombine.high %v2142_v63, %v2142_v63 }
 0x3dc   :  { %v2295_v44 = vcombine.high %v2287_v30, %v2287_v30  ;;  %v2303_v10 = vrot.slane %v2287_v30, %v3637_v35  ;;  %v2326_v53 = vcombine.high %v2310_v40, %v2310_v40  ;;  %v2166_v17 = vcombine.high %v2156_v49, %v2156_v49 }
 0x3dd   :  { %v4114_v51 = vadd.f32 %v2328_v48, %v2181_v8  ;;  %v4117_v18 = vadd.f32 %v2310_v40, %v2163_v13  ;;  %v2543_v54 = vrot.slane %v2535_v34, %v3452_v28  ;;  %v2374_v50 = vrot.slane %v1605_v42, %v3452_v28  ;;  %v2536_v42 = vld [vmem:[%s4273_s6 + $0x58] sm:$0xff] }
 0x3de   :  { %v2317_v55 = vrot.slane %v2295_v44, %v3637_v35  ;;  %v2325_v60 = vcombine.high %v2303_v10, %v2303_v10  ;;  %v4120_v14 = vadd.f32 %v2303_v10, %v2156_v49  ;;  %v4122_v58 = vadd.f32 %v2326_v53, %v2167_v11 }
 0x3df   :  { %v2621_v29 = vadd.f32 %v3184_v41, %v2543_v54  ;;  %v2616_v8 = vadd.f32 %v2615_v39, %v2543_v54  ;;  %v2364_v41 = vpop.permute.xlu1 %2363  ;;  %v2721_v46 = vrot.slane %v2538_v16, %v3452_v28 }
 0x3e0   :  { %v2327_v20 = vcombine.high %v2317_v55, %v2317_v55  ;;  %v4124_v24 = vadd.f32 %v2317_v55, %v2164_v5  ;;  %v4126_v43 = vadd.f32 %v2325_v60, %v2166_v17  ;;  %v2375_v61 = vmul.f32 %v2374_v50, %v2364_v41 }
 0x3e1   :  { %v2624_v6 = vmax.f32 %v2616_v8, 0.0  ;;  %v2625_v62 = vmax.f32 %v2621_v29, 0.0  ;;  %v2723_v32 = vcombine.high %v2721_v46, %v2721_v46  ;;  %v2730_v37 = vrot.slane %v2721_v46, %v3637_v35 }
 0x3e2   :  { %v4128_v1 = vadd.f32 %v2327_v20, %v2149_v22  ;;  %v2379_v15 = vcombine.high %v2375_v61, %v2375_v61  ;;  %v2386_v9 = vrot.slane %v2375_v61, %v3637_v35 }
 0x3e3   :  { %3199 = vmatprep.mubr.msk.f32.mxu1 %vm2630_vm7, %v2624_v6  ;;  %v2369_v39 = vpop.permute.xlu1 %2368  ;;  %v2737_v3 = vrot.slane %v2723_v32, %v3637_v35  ;;  %v2738_v31 = vcombine.high %v2730_v37, %v2730_v37  ;;  %v4158_v36 = vrot.slane %v2730_v37, %v3637_v35 }
 0x3e4   :  { %3200 = vmatmul.mubr.msk.f32.vlgmr.msra.gmra.mrb[8].mxu1 %vm2630_vm7, %v2625_v62  ;;  %v2376_v33 = vmul.f32 %v2374_v50, %v2369_v39  ;;  %v2393_v52 = vrot.slane %v2379_v15, %v3637_v35  ;;  %v2394_v47 = vcombine.high %v2386_v9, %v2386_v9  ;;  %v2402_v27 = vrot.slane %v2386_v9, %v3637_v35 }
 0x3e5   :  { %v2739_v30 = vcombine.high %v2737_v3, %v2737_v3  ;;  %v4161_v44 = vrot.slane %v2737_v3, %v3637_v35  ;;  %v4164_v10 = vrot.slane %v2738_v31, %v3637_v35  ;;  %v2768_v20 = vcombine.high %v4158_v36, %v4158_v36 }
 0x3e6   :  { %v2428_v38 = vcombine.high %v2376_v33, %v2376_v33  ;;  %v2395_v22 = vcombine.high %v2393_v52, %v2393_v52  ;;  %v2435_v56 = vrot.slane %v2376_v33, %v3637_v35  ;;  %v2416_v13 = vrot.slane %v2394_v47, %v3637_v35  ;;  %v2537_v47 = vld [vmem:[%s4273_s6 + $0x60] sm:$0xff] }
 0x3e7   :  { %v2409_v21 = vrot.slane %v2393_v52, %v3637_v35  ;;  %v2424_v40 = vcombine.high %v2402_v27, %v2402_v27  ;;  %v2493_v34 = vadd.f32 %v2402_v27, %v4088_v12  ;;  %v4175_v8 = vrot.slane %v2739_v30, %v3637_v35 }
 0x3e8   :  { %v2442_v45 = vrot.slane %v2428_v38, %v3637_v35  ;;  %v2423_v63 = vrot.slane %v2395_v22, %v3637_v35  ;;  %v2443_v49 = vcombine.high %v2435_v56, %v2435_v56  ;;  %v2426_v11 = vcombine.high %v2416_v13, %v2416_v13 }
 0x3e9   :  { %v2451_v53 = vrot.slane %v2435_v56, %v3637_v35  ;;  %v2425_v5 = vcombine.high %v2409_v21, %v2409_v21  ;;  %v2494_v54 = vadd.f32 %v2416_v13, %v4092_v26  ;;  %v2495_v6 = vadd.f32 %v2424_v40, %v4094_v7 }
 0x3ea   :  { %v2444_v48 = vcombine.high %v2442_v45, %v2442_v45  ;;  %v2427_v17 = vcombine.high %v2423_v63, %v2423_v63  ;;  %v2458_v55 = vrot.slane %v2442_v45, %v3637_v35  ;;  %v2465_v60 = vrot.slane %v2443_v49, %v3637_v35 }
 0x3eb   :  { %v2496_v62 = vadd.f32 %v2426_v11, %v4100_v2  ;;  %v2497_v23 = vadd.f32 %v2409_v21, %v4096_v59  ;;  %v2769_v12 = vcombine.high %v4161_v44, %v4161_v44  ;;  %v2770_v26 = vcombine.high %v4164_v10, %v4164_v10 }
 0x3ec   :  { %v2472_v29 = vrot.slane %v2444_v48, %v3637_v35  ;;  %v2498_v50 = vadd.f32 %v2423_v63, %v4102_v19  ;;  %v2473_v41 = vcombine.high %v2451_v53, %v2451_v53  ;;  %v2499_v61 = vadd.f32 %v2425_v5, %v4104_v4 }
 0x3ed   :  { %v4190_v7 = vadd.f32 %v2427_v17, %v4108_v57  ;;  %v2474_v2 = vcombine.high %v2458_v55, %v2458_v55  ;;  %v2475_v59 = vcombine.high %v2465_v60, %v2465_v60  ;;  %v2509_v39 = vmax.f32 %v2493_v34, 0.0 }
 0x3ee   :  { %v2510_v16 = vmax.f32 %v2494_v54, 0.0  ;;  %v2476_v15 = vcombine.high %v2472_v29, %v2472_v29  ;;  %v2629_v33 = vrot.slane %v2536_v42, %v3452_v28  ;;  %v2511_v46 = vmax.f32 %v2495_v6, 0.0 }
 0x3ef   :  { %v2512_v9 = vmax.f32 %v2496_v62, 0.0  ;;  %v2513_v52 = vmax.f32 %v2497_v23, 0.0  ;;  %v2771_v38 = vcombine.high %v4175_v8, %v4175_v8  ;;  %v2514_v19 = vmax.f32 %v2498_v50, 0.0 }
 0x3f0   :  { %v2501_v32 = vadd.f32 %v2451_v53, %v4120_v14  ;;  %v2502_v4 = vadd.f32 %v2465_v60, %v4124_v24  ;;  %v2503_v57 = vadd.f32 %v2473_v41, %v4126_v43  ;;  %v2515_v37 = vmax.f32 %v2499_v61, 0.0 }
 0x3f1   :  { %v2516_v22 = vmax.f32 %v4190_v7, 0.0  ;;  %v2504_v56 = vadd.f32 %v2475_v59, %v4128_v1  ;;  %v2505_v45 = vadd.f32 %v2458_v55, %v4117_v18  ;;  %v4205_v3 = vmul.f32 %v4158_v36, %v2509_v39 }
 0x3f2   :  { %v4208_v14 = vmul.f32 %v4164_v10, %v2510_v16  ;;  %v2506_v24 = vadd.f32 %v2472_v29, %v4112_v0  ;;  %v2507_v43 = vadd.f32 %v2474_v2, %v4122_v58  ;;  %v4212_v13 = vmul.f32 %v2768_v20, %v2511_v46 }
 0x3f3   :  { %v2508_v31 = vadd.f32 %v2476_v15, %v4114_v51  ;;  %v2799_v1 = vrot.slane %v2537_v47, %v3452_v28  ;;  %v2517_v18 = vmax.f32 %v2501_v32, 0.0  ;;  %v2518_v49 = vmax.f32 %v2502_v4, 0.0 }
 0x3f4   :  { %v2519_v48 = vmax.f32 %v2503_v57, 0.0  ;;  %v2783_v40 = vmul.f32 %v2770_v26, %v2512_v9  ;;  %v2520_v11 = vmax.f32 %v2504_v56, 0.0  ;;  %v2521_v53 = vmax.f32 %v2505_v45, 0.0 }
 0x3f5   :  { %v2784_v0 = vmul.f32 %v4161_v44, %v2513_v52  ;;  %v2522_v58 = vmax.f32 %v2506_v24, 0.0  ;;  %v2523_v17 = vmax.f32 %v2507_v43, 0.0  ;;  %v2785_v60 = vmul.f32 %v4175_v8, %v2514_v19 }
 0x3f6   :  { %v2786_v51 = vmul.f32 %v2769_v12, %v2515_v37  ;;  %v2524_v34 = vmax.f32 %v2508_v31, 0.0  ;;  %v2788_v28 = vmul.f32 %v4158_v36, %v2517_v18  ;;  %v2789_v29 = vmul.f32 %v4164_v10, %v2518_v49 }
 0x3f7   :  { %v2790_v6 = vmul.f32 %v2768_v20, %v2519_v48  ;;  %v2791_v23 = vmul.f32 %v2770_v26, %v2520_v11  ;;  %v2792_v42 = vmul.f32 %v4161_v44, %v2521_v53  ;;  %v2793_v61 = vmul.f32 %v4175_v8, %v2522_v58 }
 0x3f8   :  { %v2794_v7 = vmul.f32 %v2769_v12, %v2523_v17  ;;  %v2795_v10 = vmul.f32 %v2771_v38, %v2524_v34  ;;  %v2787_v15 = vmul.f32 %v2771_v38, %v2516_v22 }
 0x407   :  { %s3225_s6 = spop %3224 }
 0x4b7   :  { %v3201_v27 = vpop.f32.mrb[8].mxu1 }
 0x4b8   :  { %v2713_v21 = vadd.f32 %v3201_v27, %v2629_v33  ;;  %v2707_v63 = vpop.f32.mrb[9].mxu1 }
 0x4b9   :  { %v2708_v30 = vadd.f32 %v2707_v63, %v2629_v33 }
 0x4ba   :  { %v2717_v5 = vmax.f32 %v2713_v21, 0.0 }
 0x4bb   :  { %v2716_v55 = vmax.f32 %v2708_v30, 0.0 }
 0x4bc   :  { %v2801_v54 = vmul.f32 %v2799_v1, %v2717_v5 }
 0x4bd   :  { %v2800_v62 = vmul.f32 %v2799_v1, %v2716_v55 }
 0x4be   :  { %v2853_v50 = vcombine.high %v2801_v54, %v2801_v54  ;;  %v2860_v41 = vrot.slane %v2801_v54, %v3637_v35 }
 0x4bf   :  { %v2804_v2 = vcombine.high %v2800_v62, %v2800_v62  ;;  %v2811_v59 = vrot.slane %v2800_v62, %v3637_v35 }
 0x4c0   :  { %v2867_v39 = vrot.slane %v2853_v50, %v3637_v35  ;;  %v2868_v16 = vcombine.high %v2860_v41, %v2860_v41  ;;  %v2876_v36 = vrot.slane %v2860_v41, %v3637_v35 }
 0x4c1   :  { %v2818_v20 = vrot.slane %v2804_v2, %v3637_v35  ;;  %v2819_v26 = vcombine.high %v2811_v59, %v2811_v59  ;;  %v2827_v44 = vrot.slane %v2811_v59, %v3637_v35 }
 0x4c2   :  { %v2869_v33 = vcombine.high %v2867_v39, %v2867_v39  ;;  %v2883_v46 = vrot.slane %v2867_v39, %v3637_v35  ;;  %v2890_v8 = vrot.slane %v2868_v16, %v3637_v35  ;;  %v2898_v12 = vcombine.high %v2876_v36, %v2876_v36 }
 0x4c3   :  { %v2926_v9 = vadd.f32 %v2876_v36, %v2788_v28  ;;  %v2820_v52 = vcombine.high %v2818_v20, %v2818_v20  ;;  %v2834_v19 = vrot.slane %v2818_v20, %v3637_v35  ;;  %v2841_v32 = vrot.slane %v2819_v26, %v3637_v35 }
 0x4c4   :  { %v2897_v4 = vrot.slane %v2869_v33, %v3637_v35  ;;  %v2899_v57 = vcombine.high %v2883_v46, %v2883_v46  ;;  %v2900_v47 = vcombine.high %v2890_v8, %v2890_v8  ;;  %v2927_v37 = vadd.f32 %v2890_v8, %v2789_v29 }
 0x4c5   :  { %v2928_v56 = vadd.f32 %v2898_v12, %v2790_v6  ;;  %v2930_v45 = vadd.f32 %v2883_v46, %v2792_v42  ;;  %v2848_v38 = vrot.slane %v2820_v52, %v3637_v35  ;;  %v2849_v22 = vcombine.high %v2827_v44, %v2827_v44 }
 0x4c6   :  { %v2901_v24 = vcombine.high %v2897_v4, %v2897_v4  ;;  %v2850_v43 = vcombine.high %v2834_v19, %v2834_v19  ;;  %v2851_v27 = vcombine.high %v2841_v32, %v2841_v32  ;;  %v2918_v31 = vadd.f32 %v2827_v44, %v4205_v3 }
 0x4c7   :  { %v2852_v21 = vcombine.high %v2848_v38, %v2848_v38  ;;  %v2919_v1 = vadd.f32 %v2841_v32, %v4208_v14  ;;  %v2920_v63 = vadd.f32 %v2849_v22, %v4212_v13  ;;  %v2922_v18 = vadd.f32 %v2834_v19, %v2784_v0 }
 0x4c8   :  { %v2929_v49 = vadd.f32 %v2900_v47, %v2791_v23  ;;  %v2931_v48 = vadd.f32 %v2897_v4, %v2793_v61  ;;  %v2932_v30 = vadd.f32 %v2899_v57, %v2794_v7  ;;  %v2933_v11 = vadd.f32 %v2901_v24, %v2795_v10 }
 0x4c9   :  { %v2999_v53 = vcombine.low %v2926_v9, %v2927_v37  ;;  %v2921_v5 = vadd.f32 %v2851_v27, %v2783_v40  ;;  %v2923_v58 = vadd.f32 %v2848_v38, %v2785_v60  ;;  %v2924_v17 = vadd.f32 %v2850_v43, %v2786_v51 }
 0x4ca   :  { %v3000_v55 = vcombine.low %v2928_v56, %v2929_v49  ;;  %v3001_v34 = vcombine.low %v2930_v45, %v2931_v48  ;;  %v3002_v54 = vcombine.low %v2932_v30, %v2933_v11  ;;  %v2925_v28 = vadd.f32 %v2852_v21, %v2787_v15 }
 0x4cb   :  { %v3009_v3 = vrot.slane %v2999_v53, %v3637_v35  ;;  %v2950_v29 = vcombine.low %v2918_v31, %v2919_v1  ;;  %v2951_v6 = vcombine.low %v2920_v63, %v2921_v5  ;;  %v2952_v14 = vcombine.low %v2922_v18, %v2923_v58 }
 0x4cc   :  { %v3016_v13 = vrot.slane %v3000_v55, %v3637_v35  ;;  %v3023_v0 = vrot.slane %v3001_v34, %v3637_v35  ;;  %v3030_v62 = vrot.slane %v3002_v54, %v3637_v35  ;;  %v2953_v23 = vcombine.low %v2924_v17, %v2925_v28 }
 0x4cd   :  { %v2960_v40 = vrot.slane %v2950_v29, %v3637_v35  ;;  %v2967_v60 = vrot.slane %v2951_v6, %v3637_v35  ;;  %v2974_v50 = vrot.slane %v2952_v14, %v3637_v35  ;;  %v4326_v44 = vlaneseq }
 0x4ce   :  { %v3031_v51 = vcombine.low %v3009_v3, %v3016_v13  ;;  %v3032_v42 = vcombine.low %v3023_v0, %v3030_v62  ;;  %v2981_v41 = vrot.slane %v2953_v23, %v3637_v35  ;;  %v3058_v46 = vstv %s3225_s6 }
 0x4cf   :  { %v2982_v61 = vcombine.low %v2960_v40, %v2967_v60  ;;  %v3065_v15 = vand.u32 127, %v4326_v44 }
 0x4d0   :  { %v3039_v7 = vrot.slane %v3031_v51, %v3637_v35  ;;  %v3046_v2 = vrot.slane %v3032_v42, %v3637_v35  ;;  %v2983_v59 = vcombine.low %v2974_v50, %v2981_v41 }
 0x4d1   :  { %v2990_v16 = vrot.slane %v2982_v61, %v3637_v35  ;;  %v3070_v33 = vadd.s32 4294967288, %v3065_v15  ;;  %v3068_v52 = vsub.s32 %v3065_v15, %v3445_v25 }
 0x4d2   :  { %v3047_v39 = vcombine.low %v3039_v7, %v3046_v2  ;;  %v2997_v36 = vrot.slane %v2983_v59, %v3637_v35 }
 0x4d3   :  { %v3073_v8 = vsub.s32 %v3070_v33, %v3445_v25 }
 0x4d4   :  { %v3053_v10 = vsel %vm2630_vm7, %v3047_v39, 0.0  ;;  %v2998_v20 = vcombine.low %v2990_v16, %v2997_v36 }
 0x4d5   :  { %3054 = vadd.xlane.f32.xlu1 %v3053_v10 }
 0x4d6   :  { %v3050_v26 = vsel %vm2630_vm7, %v2998_v20, 0.0 }
 0x4d7   :  { %3051 = vadd.xlane.f32.xlu0 %v3050_v26 }
 0x562   :  { %v3055_v12 = vpop.xlane.xlu1 %3054 }
 0x563   :  { %v3061_v9 = vadd.f32 %v3058_v46, %v3055_v12 }
 0x564   :  { %v3052_v19 = vpop.xlane.xlu0 %3051 }
 0x565   :  { %v3074_v35 = vrot.slane %v3061_v9, %v3073_v8  ;;  %v3060_v32 = vadd.f32 %v3058_v46, %v3052_v19 }
 0x567   :  { %v3069_v4 = vrot.slane %v3060_v32, %v3068_v52 }
 0x569   :  { %v3076_v57 = vsel %vm3075_vm8, %v3074_v35, %v3069_v4 }
 0x56a   :  { %3078 = vst.msk [vmem:[#allocation2] sm:$0x1] %vm1756_vm3, %v3076_v57 }
 0x56b   :  { %3355 = shalt.err (!%p3352_p4)
}
 0x56c   :  { %s3356_s27 = scalar_lea.hbm %s4274_s7, 16 }
 0x56d   :  { %p3357_p5 = scmp.ne.s32.totalorder %s4274_s7, %s3356_s27  ;;  %p3360_p6 = scmp.lt.u32.totalorder %s3356_s27, %s4274_s7 }
 0x56f   :  { %p3362_p7 = pnand %p3360_p6, %p3357_p5 }
 0x571   :  { %3365 = shalt.err (!%p3362_p7)
}
 0x572   :  { %3088 = dma.vmem_to_hbm [thread:$0]  %s3086_s23, 16, %s4274_s7, [#allocation3]  }
 0x573   :  { %3366 = dma.done.wait [#allocation3], 16  }
 0x574   :  { %3367 = vsyncadd [#allocation3], 4294967280 }
 0x575   :  { %3092 = vsyncpa [#allocation3], 1 }

</bundles_post_ra>
